<compile_context>
chip_gen: v6e
topology: v6e:2x2x1
jax: 0.10.0
libtpu: 0.0.40
codegen_flags: <defaults>
</compile_context>

<pallas_src>
import functools

import jax
import jax.numpy as jnp
from jax.experimental import pallas as pl
from jax.experimental.pallas import tpu as pltpu

_LANE = 128
_MAX_K_CHUNK = 2048  # max flattened-input columns resident per grid step


def _round_up(n, m):
    return ((n + m - 1) // m) * m


def _cdiv(a, b):
    return -(-a // b)


def _k_plan(d_in):
    """Split the flattened input dim into lane-aligned chunks <= _MAX_K_CHUNK."""
    d0 = _round_up(max(d_in, 1), _LANE)
    nk = max(1, _cdiv(d0, _MAX_K_CHUNK))
    tk = _round_up(_cdiv(d0, nk), _LANE)
    return nk, tk, nk * tk  # (num K tiles, K tile width, padded d_in)


def _encoder_kernel(x_ref, w1_ref, b1_ref, w2_ref, b2_ref, w3_ref, b3_ref,
                    out_ref, acc_ref):
    k = pl.program_id(1)

    @pl.when(k == 0)
    def _():
        acc_ref[...] = jnp.zeros_like(acc_ref)

    # Layer-1 partial product. x is cast to bf16 on the VPU right before the
    # MXU; accumulation stays f32 in VMEM scratch across the K grid axis.
    acc_ref[...] += jnp.dot(x_ref[...].astype(jnp.bfloat16), w1_ref[...],
                            preferred_element_type=jnp.float32)

    @pl.when(k == pl.num_programs(1) - 1)
    def _():
        # Bias-add / ReLU in f32 (safe on v5e's f32-only VALUs), bf16 MXU
        # operands with f32 accumulation for layers 2 and 3.
        h1 = jnp.maximum(acc_ref[...] + b1_ref[...], 0.0).astype(jnp.bfloat16)
        h2 = jnp.dot(h1, w2_ref[...], preferred_element_type=jnp.float32)
        h2 = jnp.maximum(h2 + b2_ref[...], 0.0).astype(jnp.bfloat16)
        out = jnp.dot(h2, w3_ref[...], preferred_element_type=jnp.float32)
        out_ref[...] = (out + b3_ref[...]).astype(out_ref.dtype)


def pack_params(params):
    """One-time weight packing: zero-pad to (8,128)-friendly shapes, cast the
    matmul operands to bf16 (biases stay f32). Zero-padded columns/rows plus
    zero bias keep the padded units exactly 0 through the ReLUs."""
    w1, b1 = params["w1"], params["b1"]
    w2, b2 = params["w2"], params["b2"]
    w3, b3 = params["w3"], params["b3"]
    _, _, d_in_p = _k_plan(w1.shape[0])
    h1_p = _round_up(w1.shape[1], _LANE)      # 500 -> 512
    h2_p = _round_up(w2.shape[1], _LANE)      # 500 -> 512
    d_out_p = _round_up(w3.shape[1], _LANE)   # 2*z_dim -> 128

    def pad2(a, rows, cols):
        a = jnp.asarray(a, jnp.float32).reshape(-1, a.shape[-1]) if a.ndim == 1 else a
        return jnp.pad(a, ((0, rows - a.shape[0]), (0, cols - a.shape[1])))

    return {
        "w1": pad2(w1, d_in_p, h1_p).astype(jnp.bfloat16),
        "b1": pad2(b1.astype(jnp.float32).reshape(1, -1), 1, h1_p),
        "w2": pad2(w2, h1_p, h2_p).astype(jnp.bfloat16),
        "b2": pad2(b2.astype(jnp.float32).reshape(1, -1), 1, h2_p),
        "w3": pad2(w3, h2_p, d_out_p).astype(jnp.bfloat16),
        "b3": pad2(b3.astype(jnp.float32).reshape(1, -1), 1, d_out_p),
    }


@functools.partial(jax.jit, static_argnames=("z_dim",))
def linear_encoder1_forward(x_nchw, packed, z_dim):
    """Forward pass of LinearEncoder1.

    x_nchw: (B, C_in, W, H) float32 (or bf16)
    packed: output of pack_params(params)
    returns: (mean, logvar) each (B, z_dim), float32
    """
    B = x_nchw.shape[0]
    x_flat = x_nchw.reshape(B, -1)            # same order as torch.flatten(x, 1)
    d_in = x_flat.shape[1]

    nk, tk, d_in_p = _k_plan(d_in)
    w1p, b1p = packed["w1"], packed["b1"]
    w2p, b2p = packed["w2"], packed["b2"]
    w3p, b3p = packed["w3"], packed["b3"]
    assert w1p.shape[0] == d_in_p, "packed params do not match input width"
    h1_p, h2_p, d_out_p = w1p.shape[1], w2p.shape[1], w3p.shape[1]
    assert 2 * z_dim <= d_out_p

    # Only pad the feature dim (needed for lane alignment / even K tiles);
    # the batch dim is left ragged for Pallas partial-block handling.
    if d_in != d_in_p:
        x_flat = jnp.pad(x_flat, ((0, 0), (0, d_in_p - d_in)))

    # Batch tile: single tile for small B; >=2 tiles once B > 256 (keeps both
    # v7x TensorCores busy); 512-row tiles for large B.
    if B <= 256:
        tm = _round_up(max(B, 1), 8)
    elif B <= 1024:
        tm = 256
    else:
        tm = 512
    grid = (_cdiv(B, tm), nk)

    itemsize = x_flat.dtype.itemsize
    n_rows = grid[0] * tm
    flops = 2 * n_rows * (d_in_p * h1_p + h1_p * h2_p + h2_p * d_out_p)
    bytes_accessed = (
        B * d_in_p * itemsize                        # x streamed once
        + grid[0] * w1p.size * 2                     # w1 re-fetched per batch tile
        + (w2p.size + w3p.size) * 2                  # resident bf16 weights, once
        + (b1p.size + b2p.size + b3p.size) * 4       # f32 biases, once
        + B * d_out_p * 4)                           # f32 output

    # VMEM footprint estimate (double-buffered streaming operands + scratch).
    vmem_est = (
        2 * tm * tk * itemsize                       # x tile
        + 2 * tk * h1_p * 2                          # w1 K-chunk (bf16)
        + (h1_p * h2_p + h2_p * d_out_p) * 2         # resident w2, w3 (bf16)
        + (h1_p + h2_p + d_out_p) * 4                # biases
        + tm * h1_p * 4                              # f32 accumulator scratch
        + tm * h2_p * 4                              # live intermediate (approx)
        + 2 * tm * d_out_p * 4)                      # output tile
    vmem_limit = int(min(48 << 20, max(32 << 20, 2 * vmem_est)))

    out = pl.pallas_call(
        _encoder_kernel,
        out_shape=jax.ShapeDtypeStruct((B, d_out_p), jnp.float32),
        grid_spec=pltpu.PrefetchScalarGridSpec(
            num_scalar_prefetch=0,
            grid=grid,
            in_specs=[
                pl.BlockSpec((tm, tk), lambda i, k: (i, k)),       # x tile
                pl.BlockSpec((tk, h1_p), lambda i, k: (k, 0)),     # w1 K-chunk
                pl.BlockSpec((1, h1_p), lambda i, k: (0, 0)),      # b1 (resident)
                pl.BlockSpec((h1_p, h2_p), lambda i, k: (0, 0)),   # w2 (resident)
                pl.BlockSpec((1, h2_p), lambda i, k: (0, 0)),      # b2
                pl.BlockSpec((h2_p, d_out_p), lambda i, k: (0, 0)),  # w3
                pl.BlockSpec((1, d_out_p), lambda i, k: (0, 0)),   # b3
            ],
            out_specs=pl.BlockSpec((tm, d_out_p), lambda i, k: (i, 0)),
            scratch_shapes=[pltpu.VMEM((tm, h1_p), jnp.float32)],
        ),
        compiler_params=pltpu.CompilerParams(
            dimension_semantics=("parallel", "arbitrary"),
            vmem_limit_bytes=vmem_limit,
        ),
        cost_estimate=pl.CostEstimate(
            flops=int(flops), transcendentals=0,
            bytes_accessed=int(bytes_accessed)),
    )(x_flat, w1p, b1p, w2p, b2p, w3p, b3p)

    return out[:, :z_dim], out[:, z_dim:2 * z_dim]


def init_params(key, in_dim, z_dim):
    """Deterministic init mimicking PyTorch nn.Linear default (uniform +-1/sqrt(fan_in))."""
    ks = jax.random.split(key, 6)

    def lin(kw, kb, fan_in, fan_out):
        bound = 1.0 / jnp.sqrt(fan_in)
        w = jax.random.uniform(kw, (fan_in, fan_out), jnp.float32, -bound, bound)
        b = jax.random.uniform(kb, (1, fan_out), jnp.float32, -bound, bound)
        return w, b

    w1, b1 = lin(ks[0], ks[1], in_dim, 500)
    w2, b2 = lin(ks[2], ks[3], 500, 500)
    w3, b3 = lin(ks[4], ks[5], 500, 2 * z_dim)
    return {"w1": w1, "b1": b1, "w2": w2, "b2": b2, "w3": w3, "b3": b3}


if __name__ == "__main__":
    # grayscale=True => num_channels_in = 2 (per the Encoder base class)
    z_dim = 8
    image_width = 16
    image_height = 16
    num_channels_in = 2
    batch = 2

    in_dim = num_channels_in * image_width * image_height  # 2*16*16 = 512

    key = jax.random.PRNGKey(0)
    k_x, k_p = jax.random.split(key)
    x = jax.random.normal(
        k_x, (batch, num_channels_in, image_width, image_height), dtype=jnp.float32)
    params = init_params(k_p, in_dim, z_dim)

    # One-time packing (amortized across calls); not part of the per-call path.
    packed = pack_params(params)
    packed = jax.tree_util.tree_map(jax.block_until_ready, packed)

    mean, logvar = linear_encoder1_forward(x, packed, z_dim)
    jax.block_until_ready((mean, logvar))

    # Reference check in plain f32 JAX (loose tolerance since kernel uses bf16
    # matmul operands with f32 accumulation).
    xf = x.reshape(batch, -1)
    h = jnp.maximum(xf @ params["w1"] + params["b1"], 0.0)
    h = jnp.maximum(h @ params["w2"] + params["b2"], 0.0)
    ref = h @ params["w3"] + params["b3"]
    assert mean.shape == (batch, z_dim) and logvar.shape == (batch, z_dim)
    assert jnp.allclose(mean, ref[:, :z_dim], atol=3e-2, rtol=3e-2)
    assert jnp.allclose(logvar, ref[:, z_dim:], atol=3e-2, rtol=3e-2)

    print("KERNEL_OK")
</pallas_src>

<mosaic_0001>
module attributes {stable_mosaic.version = 11 : i64} {
  func.func @_encoder_kernel(%arg0: i32, %arg1: i32, %arg2: memref<8x512xf32, #tpu.memory_space<vmem>>, %arg3: memref<512x512xbf16, #tpu.memory_space<vmem>>, %arg4: memref<1x512xf32, #tpu.memory_space<vmem>>, %arg5: memref<512x512xbf16, #tpu.memory_space<vmem>>, %arg6: memref<1x512xf32, #tpu.memory_space<vmem>>, %arg7: memref<512x128xbf16, #tpu.memory_space<vmem>>, %arg8: memref<1x128xf32, #tpu.memory_space<vmem>>, %arg9: memref<8x128xf32, #tpu.memory_space<vmem>>, %arg10: memref<8x512xf32, #tpu.memory_space<vmem>>) attributes {dimension_semantics = [#tpu.dimension_semantics<parallel>, #tpu.dimension_semantics<arbitrary>], iteration_bounds = array<i64: 1, 1>, scalar_prefetch = 0 : i64, scratch_operands = 1 : i64, tpu.core_type = #tpu.core_type<tc>, window_params = [{transform_indices = @transform_0, window_bounds = array<i64: 8, 512>}, {transform_indices = @transform_1, window_bounds = array<i64: 512, 512>}, {pipeline_mode = #tpu.pipeline_mode<synchronous>, transform_indices = @transform_2, window_bounds = array<i64: 1, 512>}, {pipeline_mode = #tpu.pipeline_mode<synchronous>, transform_indices = @transform_3, window_bounds = array<i64: 512, 512>}, {pipeline_mode = #tpu.pipeline_mode<synchronous>, transform_indices = @transform_4, window_bounds = array<i64: 1, 512>}, {pipeline_mode = #tpu.pipeline_mode<synchronous>, transform_indices = @transform_5, window_bounds = array<i64: 512, 128>}, {pipeline_mode = #tpu.pipeline_mode<synchronous>, transform_indices = @transform_6, window_bounds = array<i64: 1, 128>}, {transform_indices = @transform_7, window_bounds = array<i64: 8, 128>}]} {
    %c0_i32 = arith.constant 0 : i32
    %0 = arith.cmpi eq, %arg1, %c0_i32 : i32
    %1 = arith.extui %0 : i1 to i32
    %c0_i32_0 = arith.constant 0 : i32
    %2 = arith.cmpi ne, %1, %c0_i32_0 : i32
    scf.if %2 {
      %cst_10 = arith.constant 0.000000e+00 : f32
      %13 = vector.broadcast %cst_10 : f32 to vector<8x512xf32>
      %c0_11 = arith.constant 0 : index
      %c0_12 = arith.constant 0 : index
      %14 = vector.load %arg10[%c0_11, %c0_12] : memref<8x512xf32, #tpu.memory_space<vmem>>, vector<8x512xf32>
      tpu.vector_store %arg10[%c0_11, %c0_12], %13 {strides = array<i32>} : memref<8x512xf32, #tpu.memory_space<vmem>>, vector<8x512xf32>,
    } else {
    }
    %c0 = arith.constant 0 : index
    %c0_1 = arith.constant 0 : index
    %3 = vector.load %arg10[%c0, %c0_1] : memref<8x512xf32, #tpu.memory_space<vmem>>, vector<8x512xf32>
    %c0_2 = arith.constant 0 : index
    %c0_3 = arith.constant 0 : index
    %4 = vector.load %arg2[%c0_2, %c0_3] : memref<8x512xf32, #tpu.memory_space<vmem>>, vector<8x512xf32>
    %5 = arith.truncf %4 : vector<8x512xf32> to vector<8x512xbf16>
    %c0_4 = arith.constant 0 : index
    %c0_5 = arith.constant 0 : index
    %6 = vector.load %arg3[%c0_4, %c0_5] : memref<512x512xbf16, #tpu.memory_space<vmem>>, vector<512x512xbf16>
    %cst = arith.constant dense<0.000000e+00> : vector<8x512xf32>
    %7 = tpu.matmul %5, %6, %cst {dimension_numbers = #tpu.dot_dimension_numbers<[1], [0], [0], [1], [0, 0, 1, 1], [], []>} : vector<8x512xbf16>, vector<512x512xbf16>, vector<8x512xf32> -> vector<8x512xf32>
    %8 = arith.addf %3, %7 : vector<8x512xf32>
    %c0_6 = arith.constant 0 : index
    %c0_7 = arith.constant 0 : index
    %9 = vector.load %arg10[%c0_6, %c0_7] : memref<8x512xf32, #tpu.memory_space<vmem>>, vector<8x512xf32>
    tpu.vector_store %arg10[%c0_6, %c0_7], %8 {strides = array<i32>} : memref<8x512xf32, #tpu.memory_space<vmem>>, vector<8x512xf32>,
    %c0_i32_8 = arith.constant 0 : i32
    %10 = arith.cmpi eq, %arg1, %c0_i32_8 : i32
    %11 = arith.extui %10 : i1 to i32
    %c0_i32_9 = arith.constant 0 : i32
    %12 = arith.cmpi ne, %11, %c0_i32_9 : i32
    scf.if %12 {
      %c0_10 = arith.constant 0 : index
      %c0_11 = arith.constant 0 : index
      %13 = vector.load %arg10[%c0_10, %c0_11] : memref<8x512xf32, #tpu.memory_space<vmem>>, vector<8x512xf32>
      %c0_12 = arith.constant 0 : index
      %c0_13 = arith.constant 0 : index
      %14 = vector.load %arg4[%c0_12, %c0_13] : memref<1x512xf32, #tpu.memory_space<vmem>>, vector<1x512xf32>
      %15 = vector.broadcast %14 : vector<1x512xf32> to vector<8x512xf32>
      %16 = arith.addf %13, %15 : vector<8x512xf32>
      %cst_14 = arith.constant 0.000000e+00 : f32
      %17 = vector.broadcast %cst_14 : f32 to vector<8x512xf32>
      %18 = arith.maximumf %16, %17 : vector<8x512xf32>
      %19 = arith.truncf %18 : vector<8x512xf32> to vector<8x512xbf16>
      %c0_15 = arith.constant 0 : index
      %c0_16 = arith.constant 0 : index
      %20 = vector.load %arg5[%c0_15, %c0_16] : memref<512x512xbf16, #tpu.memory_space<vmem>>, vector<512x512xbf16>
      %cst_17 = arith.constant dense<0.000000e+00> : vector<8x512xf32>
      %21 = tpu.matmul %19, %20, %cst_17 {dimension_numbers = #tpu.dot_dimension_numbers<[1], [0], [0], [1], [0, 0, 1, 1], [], []>} : vector<8x512xbf16>, vector<512x512xbf16>, vector<8x512xf32> -> vector<8x512xf32>
      %c0_18 = arith.constant 0 : index
      %c0_19 = arith.constant 0 : index
      %22 = vector.load %arg6[%c0_18, %c0_19] : memref<1x512xf32, #tpu.memory_space<vmem>>, vector<1x512xf32>
      %23 = vector.broadcast %22 : vector<1x512xf32> to vector<8x512xf32>
      %24 = arith.addf %21, %23 : vector<8x512xf32>
      %cst_20 = arith.constant 0.000000e+00 : f32
      %25 = vector.broadcast %cst_20 : f32 to vector<8x512xf32>
      %26 = arith.maximumf %24, %25 : vector<8x512xf32>
      %27 = arith.truncf %26 : vector<8x512xf32> to vector<8x512xbf16>
      %c0_21 = arith.constant 0 : index
      %c0_22 = arith.constant 0 : index
      %28 = vector.load %arg7[%c0_21, %c0_22] : memref<512x128xbf16, #tpu.memory_space<vmem>>, vector<512x128xbf16>
      %cst_23 = arith.constant dense<0.000000e+00> : vector<8x128xf32>
      %29 = tpu.matmul %27, %28, %cst_23 {dimension_numbers = #tpu.dot_dimension_numbers<[1], [0], [0], [1], [0, 0, 1, 1], [], []>} : vector<8x512xbf16>, vector<512x128xbf16>, vector<8x128xf32> -> vector<8x128xf32>
      %c0_24 = arith.constant 0 : index
      %c0_25 = arith.constant 0 : index
      %30 = vector.load %arg8[%c0_24, %c0_25] : memref<1x128xf32, #tpu.memory_space<vmem>>, vector<1x128xf32>
      %31 = vector.broadcast %30 : vector<1x128xf32> to vector<8x128xf32>
      %32 = arith.addf %29, %31 : vector<8x128xf32>
      %c0_26 = arith.constant 0 : index
      %c0_27 = arith.constant 0 : index
      %33 = vector.load %arg9[%c0_26, %c0_27] : memref<8x128xf32, #tpu.memory_space<vmem>>, vector<8x128xf32>
      tpu.vector_store %arg9[%c0_26, %c0_27], %32 {strides = array<i32>} : memref<8x128xf32, #tpu.memory_space<vmem>>, vector<8x128xf32>,
    } else {
    }
    return
  }
  func.func @transform_0(%arg0: i32, %arg1: i32) -> (i32, i32) {
    %c0_i32 = arith.constant 0 : i32
    return %arg0, %arg1 : i32, i32
  }
  func.func @transform_1(%arg0: i32, %arg1: i32) -> (i32, i32) {
    %c0_i32 = arith.constant 0 : i32
    %c0_i32_0 = arith.constant 0 : i32
    return %arg1, %c0_i32 : i32, i32
  }
  func.func @transform_2(%arg0: i32, %arg1: i32) -> (i32, i32) {
    %c0_i32 = arith.constant 0 : i32
    %c0_i32_0 = arith.constant 0 : i32
    %c0_i32_1 = arith.constant 0 : i32
    return %c0_i32, %c0_i32_0 : i32, i32
  }
  func.func @transform_3(%arg0: i32, %arg1: i32) -> (i32, i32) {
    %c0_i32 = arith.constant 0 : i32
    %c0_i32_0 = arith.constant 0 : i32
    %c0_i32_1 = arith.constant 0 : i32
    return %c0_i32, %c0_i32_0 : i32, i32
  }
  func.func @transform_4(%arg0: i32, %arg1: i32) -> (i32, i32) {
    %c0_i32 = arith.constant 0 : i32
    %c0_i32_0 = arith.constant 0 : i32
    %c0_i32_1 = arith.constant 0 : i32
    return %c0_i32, %c0_i32_0 : i32, i32
  }
  func.func @transform_5(%arg0: i32, %arg1: i32) -> (i32, i32) {
    %c0_i32 = arith.constant 0 : i32
    %c0_i32_0 = arith.constant 0 : i32
    %c0_i32_1 = arith.constant 0 : i32
    return %c0_i32, %c0_i32_0 : i32, i32
  }
  func.func @transform_6(%arg0: i32, %arg1: i32) -> (i32, i32) {
    %c0_i32 = arith.constant 0 : i32
    %c0_i32_0 = arith.constant 0 : i32
    %c0_i32_1 = arith.constant 0 : i32
    return %c0_i32, %c0_i32_0 : i32, i32
  }
  func.func @transform_7(%arg0: i32, %arg1: i32) -> (i32, i32) {
    %c0_i32 = arith.constant 0 : i32
    %c0_i32_0 = arith.constant 0 : i32
    return %arg0, %c0_i32 : i32, i32
  }
}

</mosaic_0001>

<bundles_post_ra>
// kernel: linear_encoder1_forward.1
= control target key start
LH: loop header
LB: loop body
LE: loop exit
PB: predicated region body
PF: predicated region fallthrough
CT: control target
= control target key end

     0   :  { %12 = vsyncpa [#allocation4], 0  ;;  %s3415_s0 = inlined_call_operand.vmem [shape: f32[2,512], index: 0, kind: input, shape index: {}]   ;;  %s3416_s1 = inlined_call_operand.hbm [shape: bf16[512,512], index: 1, kind: input, shape index: {}]   ;;  %s3417_s2 = inlined_call_operand.vmem [shape: f32[1,512], index: 2, kind: input, shape index: {}]   ;;  %s3418_s3 = inlined_call_operand.hbm [shape: bf16[512,512], index: 3, kind: input, shape index: {}]   ;;  %s3419_s4 = inlined_call_operand.vmem [shape: f32[1,512], index: 4, kind: input, shape index: {}]   ;;  %s3420_s5 = inlined_call_operand.hbm [shape: bf16[512,128], index: 5, kind: input, shape index: {}]   ;;  %s3421_s6 = inlined_call_operand.vmem [shape: f32[1,128], index: 6, kind: input, shape index: {}]   ;;  %s3422_s7 = inlined_call_operand.vmem [shape: f32[2,128], index: 7, kind: output, shape index: {}]  }
   0x1   :  { %13 = vsyncpa [#allocation6], 0  ;;  %s3289_s24 = smov [#allocation5]   ;;  %s3290_s26 = smov [#allocation3]  }
   0x2   :  { %s35_s25 = sshll.u32 %s3289_s24, 4  ;;  %s21_s27 = sshll.u32 %s3290_s26, 4  ;;  %s36_s25 = int_to_ptr.vmem [resolvable:$true] %s35_s25  ;;  %s22_s27 = int_to_ptr.vmem [resolvable:$true] %s21_s27 }
   0x3   :  { %s3233_s28 = scalar_lea.vmem %s36_s25, 16384  ;;  %p3238_p1 = scmp.lt.s32.totalorder %s36_s25, %s36_s25 }
   0x4   :  { %p3234_p0 = scmp.ne.s32.totalorder %s36_s25, %s3233_s28  ;;  %p3239_p2 = scmp.lt.s32.totalorder %s3233_s28, %s3233_s28 }
   0x6   :  { %p3240_p3 = por %p3239_p2, %p3238_p1 }
   0x8   :  { %p3241_p4 = pnand %p3240_p3, %p3234_p0 }
   0xa   :  { %3244 = shalt.err (!%p3241_p4)
}
   0xb   :  { %s3291_s29 = smov 256   ;;  %s3292_s30 = smov 16  }
   0xc   :  { %41 = dma.hbm_to_vmem [thread:$0]  %s3418_s3, 16384, %s36_s25, [#allocation6], %s3291_s29, %s3291_s29, %s3292_s30  }
   0xd   :  { %s3253_s10 = scalar_lea.vmem %s22_s27, 16384  ;;  %p3258_p6 = scmp.lt.s32.totalorder %s22_s27, %s22_s27 }
   0xe   :  { %p3254_p5 = scmp.ne.s32.totalorder %s22_s27, %s3253_s10  ;;  %p3259_p7 = scmp.lt.s32.totalorder %s3253_s10, %s3253_s10 }
  0x10   :  { %p3260_p8 = por %p3259_p7, %p3258_p6 }
  0x12   :  { %p3261_p9 = pnand %p3260_p8, %p3254_p5 }
  0x14   :  { %3264 = shalt.err (!%p3261_p9)
}
  0x15   :  { %27 = dma.hbm_to_vmem [thread:$0]  %s3416_s1, 16384, %s22_s27, [#allocation4], %s3291_s29, %s3291_s29, %s3292_s30  }
  0x16   :  { %s3293_s13 = smov [#allocation7]  }
  0x17   :  { %s49_s14 = sshll.u32 %s3293_s13, 4  ;;  %s50_s14 = int_to_ptr.vmem [resolvable:$true] %s49_s14 }
  0x18   :  { %s3273_s15 = scalar_lea.vmem %s50_s14, 4096  ;;  %p3278_p11 = scmp.lt.s32.totalorder %s50_s14, %s50_s14 }
  0x19   :  { %p3274_p10 = scmp.ne.s32.totalorder %s50_s14, %s3273_s15  ;;  %p3279_p12 = scmp.lt.s32.totalorder %s3273_s15, %s3273_s15 }
  0x1b   :  { %p3280_p13 = por %p3279_p12, %p3278_p11 }
  0x1d   :  { %p3281_p0 = pnand %p3280_p13, %p3274_p10 }
  0x1f   :  { %3284 = shalt.err (!%p3281_p0)
}
  0x20   :  { %s3294_s3 = smov 64   ;;  %s3295_s16 = smov 4  }
  0x21   :  { %55 = dma.hbm_to_vmem [thread:$0]  %s3420_s5, 4096, %s50_s14, [#allocation6], %s3294_s3, %s3294_s3, %s3295_s16  }
  0x22   :  { %3285 = dma.done.wait [#allocation4], 16384  }
  0x23   :  { %3286 = vsyncadd [#allocation4], 4294950912 }
  0x24   :  { %3287 = dma.done.wait [#allocation6], 20480  }
  0x25   :  { %3288 = vsyncadd [#allocation6], 4294946816  ;;  %v2803_v0 = vld [vmem:[#allocation3 + $0xe4] ss:$16 sps:$4 sm:$0xff]   ;;  %v2807_v2 = vld [vmem:[#allocation3 + $0xe0] ss:$16 sps:$4 sm:$0xff]   ;;  %v95_v40 = vlaneseq }
  0x26   :  { %v2805_v1 = vld [vmem:[#allocation3 + $0x2e4] ss:$16 sps:$4 sm:$0xff]   ;;  %900 = vmatprep.subr.bf16.mxu0 %v2803_v0  ;;  %v2808_v3 = vld [vmem:[#allocation3 + $0x2e0] ss:$16 sps:$4 sm:$0xff]   ;;  %v3296_v38 = vmov 1983009808  }
  0x27   :  { %941 = vmatprep.subr.bf16.mxu1 %v2805_v1  ;;  %v2809_v4 = vld [vmem:[#allocation3 + $0xc4] ss:$16 sps:$4 sm:$0xff]   ;;  %901 = vmatpush1.bf16.msra.mxu0 %v2807_v2  ;;  %v2813_v6 = vld [vmem:[#allocation3 + $0xc0] ss:$16 sps:$4 sm:$0xff]   ;;  %v93_v39 = vunpack.c.l.s4 %v3296_v38  ;;  %v3346_v46 = vshrl.u32 %v95_v40, 7 }
  0x28   :  { %942 = vmatpush1.bf16.msra.mxu1 %v2808_v3  ;;  %v2811_v5 = vld [vmem:[#allocation3 + $0x2c4] ss:$16 sps:$4 sm:$0xff]   ;;  %902 = vmatprep.subr.bf16.mxu0 %v2809_v4  ;;  %v2814_v7 = vld [vmem:[#allocation3 + $0x2c0] ss:$16 sps:$4 sm:$0xff]   ;;  %v2931_v38 = vld [vmem:[#allocation3 + $0x6c] ss:$16 sps:$4 sm:$0xff]  }
  0x29   :  { %943 = vmatprep.subr.bf16.mxu1 %v2811_v5  ;;  %v2815_v8 = vld [vmem:[#allocation3 + $0xa4] ss:$16 sps:$4 sm:$0xff]   ;;  %v2819_v10 = vld [vmem:[#allocation3 + $0xa0] ss:$16 sps:$4 sm:$0xff]   ;;  %v94_v45 = vunpack.c.0.s8 %v93_v39  ;;  %v2934_v39 = vld [vmem:[#allocation3 + $0x26c] ss:$16 sps:$4 sm:$0xff]  }
  0x2a   :  { %v2817_v9 = vld [vmem:[#allocation3 + $0x2a4] ss:$16 sps:$4 sm:$0xff]   ;;  %v2820_v11 = vld [vmem:[#allocation3 + $0x2a0] ss:$16 sps:$4 sm:$0xff]   ;;  %v2929_v40 = vld [vmem:[#allocation3 + $0x68] ss:$16 sps:$4 sm:$0xff]  }
  0x2b   :  { %903 = vmatpush1.bf16.msra.mxu0 %v2813_v6  ;;  %v2821_v12 = vld [vmem:[#allocation3 + $0x84] ss:$16 sps:$4 sm:$0xff]   ;;  %v2825_v14 = vld [vmem:[#allocation3 + $0x80] ss:$16 sps:$4 sm:$0xff]   ;;  %v97_v53 = vsub.s32 %v94_v45, %v3346_v46  ;;  %v2938_v45 = vld [vmem:[#allocation3 + $0x248] ss:$16 sps:$4 sm:$0xff]  }
  0x2c   :  { %944 = vmatpush1.bf16.msra.mxu1 %v2814_v7  ;;  %904 = vmatprep.subr.bf16.mxu0 %v2815_v8  ;;  %v2823_v13 = vld [vmem:[#allocation3 + $0x284] ss:$16 sps:$4 sm:$0xff]   ;;  %v2826_v15 = vld [vmem:[#allocation3 + $0x280] ss:$16 sps:$4 sm:$0xff]  }
  0x2d   :  { %945 = vmatprep.subr.bf16.mxu1 %v2817_v9  ;;  %v2827_v16 = vld [vmem:[#allocation3 + $0x64] ss:$16 sps:$4 sm:$0xff]   ;;  %v2831_v18 = vld [vmem:[#allocation3 + $0x60] ss:$16 sps:$4 sm:$0xff]  }
  0x2e   :  { %v2829_v17 = vld [vmem:[#allocation3 + $0x264] ss:$16 sps:$4 sm:$0xff]   ;;  %v2832_v19 = vld [vmem:[#allocation3 + $0x260] ss:$16 sps:$4 sm:$0xff]  }
  0x2f   :  { %905 = vmatpush1.bf16.msra.mxu0 %v2819_v10  ;;  %v2833_v20 = vld [vmem:[#allocation3 + $0x44] ss:$16 sps:$4 sm:$0xff]   ;;  %v2837_v22 = vld [vmem:[#allocation3 + $0x40] ss:$16 sps:$4 sm:$0xff]  }
  0x30   :  { %946 = vmatpush1.bf16.msra.mxu1 %v2820_v11  ;;  %906 = vmatprep.subr.bf16.mxu0 %v2821_v12  ;;  %v2835_v21 = vld [vmem:[#allocation3 + $0x244] ss:$16 sps:$4 sm:$0xff]   ;;  %v2838_v23 = vld [vmem:[#allocation3 + $0x240] ss:$16 sps:$4 sm:$0xff]  }
  0x31   :  { %947 = vmatprep.subr.bf16.mxu1 %v2823_v13  ;;  %v2839_v24 = vld [vmem:[#allocation3 + $0x24] ss:$16 sps:$4 sm:$0xff]   ;;  %v2843_v26 = vld [vmem:[#allocation3 + $0x20] ss:$16 sps:$4 sm:$0xff]  }
  0x32   :  { %v2841_v25 = vld [vmem:[#allocation3 + $0x224] ss:$16 sps:$4 sm:$0xff]   ;;  %v2844_v27 = vld [vmem:[#allocation3 + $0x220] ss:$16 sps:$4 sm:$0xff]  }
  0x33   :  { %907 = vmatpush1.bf16.msra.mxu0 %v2825_v14  ;;  %v2845_v28 = vld [vmem:[#allocation3 + $0x4] ss:$16 sps:$4 sm:$0xff]   ;;  %v2849_v30 = vld [vmem:[#allocation3] ss:$16 sps:$4 sm:$0xff]  }
  0x34   :  { %948 = vmatpush1.bf16.msra.mxu1 %v2826_v15  ;;  %908 = vmatprep.subr.bf16.mxu0 %v2827_v16  ;;  %v2847_v29 = vld [vmem:[#allocation3 + $0x204] ss:$16 sps:$4 sm:$0xff]   ;;  %v2850_v31 = vld [vmem:[#allocation3 + $0x200] ss:$16 sps:$4 sm:$0xff]  }
  0x35   :  { %949 = vmatprep.subr.bf16.mxu1 %v2829_v17  ;;  %v2851_v32 = vld [vmem:[#allocation3 + $0x1e4] ss:$16 sps:$4 sm:$0xff]   ;;  %v2855_v34 = vld [vmem:[#allocation3 + $0x1e0] ss:$16 sps:$4 sm:$0xff]  }
  0x36   :  { %v2853_v33 = vld [vmem:[#allocation3 + $0x3e4] ss:$16 sps:$4 sm:$0xff]   ;;  %v2856_v35 = vld [vmem:[#allocation3 + $0x3e0] ss:$16 sps:$4 sm:$0xff]  }
  0x37   :  { %909 = vmatpush1.bf16.msra.mxu0 %v2831_v18  ;;  %v2857_v36 = vld [vmem:[#allocation3 + $0x1c4] ss:$16 sps:$4 sm:$0xff]   ;;  %v2861_v41 = vld [vmem:[#allocation3 + $0x1c0] ss:$16 sps:$4 sm:$0xff]  }
  0x38   :  { %950 = vmatpush1.bf16.msra.mxu1 %v2832_v19  ;;  %910 = vmatprep.subr.bf16.mxu0 %v2833_v20  ;;  %v2859_v37 = vld [vmem:[#allocation3 + $0x3c4] ss:$16 sps:$4 sm:$0xff]   ;;  %v2862_v42 = vld [vmem:[#allocation3 + $0x3c0] ss:$16 sps:$4 sm:$0xff]   ;;  %v2907_v20 = vld [vmem:[#allocation3 + $0xec] ss:$16 sps:$4 sm:$0xff]  }
  0x39   :  { %951 = vmatprep.subr.bf16.mxu1 %v2835_v21  ;;  %v2863_v43 = vld [vmem:[#allocation3 + $0x1a4] ss:$16 sps:$4 sm:$0xff]   ;;  %v2867_v47 = vld [vmem:[#allocation3 + $0x1a0] ss:$16 sps:$4 sm:$0xff]   ;;  %v2910_v21 = vld [vmem:[#allocation3 + $0x2ec] ss:$16 sps:$4 sm:$0xff]  }
  0x3a   :  { %v2865_v44 = vld [vmem:[#allocation3 + $0x3a4] ss:$16 sps:$4 sm:$0xff]   ;;  %v2868_v48 = vld [vmem:[#allocation3 + $0x3a0] ss:$16 sps:$4 sm:$0xff]  }
  0x3b   :  { %911 = vmatpush1.bf16.msra.mxu0 %v2837_v22  ;;  %v2869_v49 = vld [vmem:[#allocation3 + $0x184] ss:$16 sps:$4 sm:$0xff]   ;;  %v2873_v51 = vld [vmem:[#allocation3 + $0x180] ss:$16 sps:$4 sm:$0xff]  }
  0x3c   :  { %952 = vmatpush1.bf16.msra.mxu1 %v2838_v23  ;;  %912 = vmatprep.subr.bf16.mxu0 %v2839_v24  ;;  %v2871_v50 = vld [vmem:[#allocation3 + $0x384] ss:$16 sps:$4 sm:$0xff]   ;;  %v2874_v52 = vld [vmem:[#allocation3 + $0x380] ss:$16 sps:$4 sm:$0xff]   ;;  %v2905_v24 = vld [vmem:[#allocation3 + $0xe8] ss:$16 sps:$4 sm:$0xff]  }
  0x3d   :  { %953 = vmatprep.subr.bf16.mxu1 %v2841_v25  ;;  %v2875_v54 = vld [vmem:[#allocation3 + $0x164] ss:$16 sps:$4 sm:$0xff]   ;;  %v2899_v56 = vld [vmem:[%s3415_s0] ss:$8 sps:$4 sm:$0xff]   ;;  %v2901_v57 = vld [vmem:[%s3415_s0 + $0x10] ss:$8 sps:$4 sm:$0xff]  }
  0x3e   :  { %v2877_v55 = vld [vmem:[#allocation3 + $0x364] ss:$16 sps:$4 sm:$0xff]   ;;  %v98_v60 = vrot.slane %v2899_v56, %v97_v53  ;;  %v112_v61 = vrot.slane %v2901_v57, %v97_v53  ;;  %v2879_v63 = vld [vmem:[#allocation3 + $0x160] ss:$16 sps:$4 sm:$0xff]   ;;  %v2908_v25 = vld [vmem:[#allocation3 + $0x2e8] ss:$16 sps:$4 sm:$0xff]  }
  0x3f   :  { %913 = vmatpush1.bf16.msra.mxu0 %v2843_v26  ;;  %v2903_v58 = vld [vmem:[%s3415_s0 + $0x4] ss:$8 sps:$4 sm:$0xff]   ;;  %v2904_v59 = vld [vmem:[%s3415_s0 + $0x14] ss:$8 sps:$4 sm:$0xff]   ;;  %v2880_v0 = vld [vmem:[#allocation3 + $0x360] ss:$16 sps:$4 sm:$0xff]  }
  0x40   :  { %954 = vmatpush1.bf16.msra.mxu1 %v2844_v27  ;;  %914 = vmatprep.subr.bf16.mxu0 %v2845_v28  ;;  %v105_v62 = vrot.slane %v2903_v58, %v97_v53  ;;  %v119_v1 = vrot.slane %v2904_v59, %v97_v53  ;;  %v2881_v2 = vld [vmem:[#allocation3 + $0x144] ss:$16 sps:$4 sm:$0xff]   ;;  %v121_v3 = vcombine.high %v98_v60, %v112_v61  ;;  %v2885_v7 = vld [vmem:[#allocation3 + $0x140] ss:$16 sps:$4 sm:$0xff]   ;;  %v2913_v26 = vld [vmem:[#allocation3 + $0xcc] ss:$16 sps:$4 sm:$0xff]  }
  0x41   :  { %955 = vmatprep.subr.bf16.mxu1 %v2847_v29  ;;  %v2883_v4 = vld [vmem:[#allocation3 + $0x344] ss:$16 sps:$4 sm:$0xff]   ;;  %v2886_v8 = vld [vmem:[#allocation3 + $0x340] ss:$16 sps:$4 sm:$0xff]   ;;  %v120_v18 = vcombine.low %v98_v60, %v112_v61  ;;  %v2916_v27 = vld [vmem:[#allocation3 + $0x2cc] ss:$16 sps:$4 sm:$0xff]  }
  0x42   :  { %v123_v5 = vcombine.high %v105_v62, %v119_v1  ;;  %v129_v6 = vpack.c.bf16 %v121_v3, %v121_v3  ;;  %v2887_v10 = vld [vmem:[#allocation3 + $0x124] ss:$16 sps:$4 sm:$0xff]   ;;  %v2891_v12 = vld [vmem:[#allocation3 + $0x120] ss:$16 sps:$4 sm:$0xff]   ;;  %v122_v19 = vcombine.low %v105_v62, %v119_v1  ;;  %v2911_v28 = vld [vmem:[#allocation3 + $0xc8] ss:$16 sps:$4 sm:$0xff]  }
  0x43   :  { %915 = vmatpush1.bf16.msra.mxu0 %v2849_v30  ;;  %v2889_v11 = vld [vmem:[#allocation3 + $0x324] ss:$16 sps:$4 sm:$0xff]   ;;  %v2892_v13 = vld [vmem:[#allocation3 + $0x320] ss:$16 sps:$4 sm:$0xff]   ;;  %v3361_v22 = vpack.c.bf16 %v120_v18, %v120_v18  ;;  %v2914_v29 = vld [vmem:[#allocation3 + $0x2c8] ss:$16 sps:$4 sm:$0xff]  }
  0x44   :  { %956 = vmatpush1.bf16.msra.mxu1 %v2850_v31  ;;  %916 = vmatprep.subr.bf16.mxu0 %v2851_v32  ;;  %v131_v9 = vpack.c.bf16 %v123_v5, %v123_v5  ;;  %v2893_v14 = vld [vmem:[#allocation3 + $0x104] ss:$16 sps:$4 sm:$0xff]   ;;  %v2897_v16 = vld [vmem:[#allocation3 + $0x100] ss:$16 sps:$4 sm:$0xff]   ;;  %v3363_v23 = vpack.c.bf16 %v122_v19, %v122_v19  ;;  %v2919_v30 = vld [vmem:[#allocation3 + $0xac] ss:$16 sps:$4 sm:$0xff]  }
  0x45   :  { %957 = vmatprep.subr.bf16.mxu1 %v2853_v33  ;;  %932 = vmatprep.mubr.bf16.mxu0 %v129_v6  ;;  %v2895_v15 = vld [vmem:[#allocation3 + $0x304] ss:$16 sps:$4 sm:$0xff]   ;;  %v2898_v17 = vld [vmem:[#allocation3 + $0x300] ss:$16 sps:$4 sm:$0xff]   ;;  %v2922_v31 = vld [vmem:[#allocation3 + $0x2ac] ss:$16 sps:$4 sm:$0xff]  }
  0x46   :  { %973 = vmatprep.mubr.bf16.mxu1 %v131_v9  ;;  %v2917_v32 = vld [vmem:[#allocation3 + $0xa8] ss:$16 sps:$4 sm:$0xff]   ;;  %v2958_v56 = vld [vmem:[#allocation3 + $0x3ec] ss:$16 sps:$4 sm:$0xff]  }
  0x47   :  { %917 = vmatpush2.bf16.msra.mxu0 %v2855_v34  ;;  %v2920_v33 = vld [vmem:[#allocation3 + $0x2a8] ss:$16 sps:$4 sm:$0xff]   ;;  %v2925_v34 = vld [vmem:[#allocation3 + $0x8c] ss:$16 sps:$4 sm:$0xff]  }
  0x48   :  { %958 = vmatpush2.bf16.msra.mxu1 %v2856_v35  ;;  %918 = vmatprep.subr.bf16.mxu0 %v2857_v36  ;;  %v2928_v35 = vld [vmem:[#allocation3 + $0x28c] ss:$16 sps:$4 sm:$0xff]   ;;  %v2923_v36 = vld [vmem:[#allocation3 + $0x88] ss:$16 sps:$4 sm:$0xff]  }
  0x49   :  { %959 = vmatprep.subr.bf16.mxu1 %v2859_v37  ;;  %v2926_v37 = vld [vmem:[#allocation3 + $0x288] ss:$16 sps:$4 sm:$0xff]   ;;  %v2961_v59 = vld [vmem:[#allocation3 + $0x1cc] ss:$16 sps:$4 sm:$0xff]  }
  0x4a   :  { %v2947_v53 = vld [vmem:[#allocation3 + $0x8] ss:$16 sps:$4 sm:$0xff]   ;;  %v2964_v60 = vld [vmem:[#allocation3 + $0x3cc] ss:$16 sps:$4 sm:$0xff]  }
  0x4b   :  { %919 = vmatpush2.bf16.msra.mxu0 %v2861_v41  ;;  %v2932_v41 = vld [vmem:[#allocation3 + $0x268] ss:$16 sps:$4 sm:$0xff]   ;;  %v2973_v3 = vld [vmem:[#allocation3 + $0x18c] ss:$16 sps:$4 sm:$0xff]  }
  0x4c   :  { %960 = vmatpush2.bf16.msra.mxu1 %v2862_v42  ;;  %920 = vmatprep.subr.bf16.mxu0 %v2863_v43  ;;  %v2937_v42 = vld [vmem:[#allocation3 + $0x4c] ss:$16 sps:$4 sm:$0xff]   ;;  %v2953_v57 = vld [vmem:[#allocation3 + $0x1e8] ss:$16 sps:$4 sm:$0xff]  }
  0x4d   :  { %961 = vmatprep.subr.bf16.mxu1 %v2865_v44  ;;  %v2940_v43 = vld [vmem:[#allocation3 + $0x24c] ss:$16 sps:$4 sm:$0xff]   ;;  %v2935_v44 = vld [vmem:[#allocation3 + $0x48] ss:$16 sps:$4 sm:$0xff]  }
  0x4e   :  { %v2956_v58 = vld [vmem:[#allocation3 + $0x3e8] ss:$16 sps:$4 sm:$0xff]   ;;  %v2997_v19 = vld [vmem:[#allocation3 + $0x10c] ss:$16 sps:$4 sm:$0xff]  }
  0x4f   :  { %921 = vmatpush2.bf16.msra.mxu0 %v2867_v47  ;;  %v2943_v47 = vld [vmem:[#allocation3 + $0x2c] ss:$16 sps:$4 sm:$0xff]   ;;  %v2959_v61 = vld [vmem:[#allocation3 + $0x1c8] ss:$16 sps:$4 sm:$0xff]  }
  0x50   :  { %962 = vmatpush2.bf16.msra.mxu1 %v2868_v48  ;;  %922 = vmatprep.subr.bf16.mxu0 %v2869_v49  ;;  %v2946_v48 = vld [vmem:[#allocation3 + $0x22c] ss:$16 sps:$4 sm:$0xff]   ;;  %v2941_v49 = vld [vmem:[#allocation3 + $0x28] ss:$16 sps:$4 sm:$0xff]  }
  0x51   :  { %963 = vmatprep.subr.bf16.mxu1 %v2871_v50  ;;  %v2944_v50 = vld [vmem:[#allocation3 + $0x228] ss:$16 sps:$4 sm:$0xff]  }
  0x52   :  { %v2962_v62 = vld [vmem:[#allocation3 + $0x3c8] ss:$16 sps:$4 sm:$0xff]  }
  0x53   :  { %923 = vmatpush2.bf16.msra.mxu0 %v2873_v51  ;;  %v2949_v51 = vld [vmem:[#allocation3 + $0xc] ss:$16 sps:$4 sm:$0xff]   ;;  %v2965_v1 = vld [vmem:[#allocation3 + $0x1a8] ss:$16 sps:$4 sm:$0xff]  }
  0x54   :  { %964 = vmatpush2.bf16.msra.mxu1 %v2874_v52  ;;  %924 = vmatprep.subr.bf16.mxu0 %v2875_v54  ;;  %v2952_v52 = vld [vmem:[#allocation3 + $0x20c] ss:$16 sps:$4 sm:$0xff]   ;;  %v2950_v54 = vld [vmem:[#allocation3 + $0x208] ss:$16 sps:$4 sm:$0xff]  }
  0x55   :  { %965 = vmatprep.subr.bf16.mxu1 %v2877_v55  ;;  %v2955_v55 = vld [vmem:[#allocation3 + $0x1ec] ss:$16 sps:$4 sm:$0xff]   ;;  %v2971_v5 = vld [vmem:[#allocation3 + $0x188] ss:$16 sps:$4 sm:$0xff]  }
  0x56   :  { %v2992_v18 = vld [vmem:[#allocation3 + $0x328] ss:$16 sps:$4 sm:$0xff]  }
  0x57   :  { %925 = vmatpush2.bf16.msra.mxu0 %v2879_v63  ;;  %v2967_v63 = vld [vmem:[#allocation3 + $0x1ac] ss:$16 sps:$4 sm:$0xff]  }
  0x58   :  { %966 = vmatpush2.bf16.msra.mxu1 %v2880_v0  ;;  %926 = vmatprep.subr.bf16.mxu0 %v2881_v2  ;;  %v2970_v0 = vld [vmem:[#allocation3 + $0x3ac] ss:$16 sps:$4 sm:$0xff]   ;;  %v2968_v2 = vld [vmem:[#allocation3 + $0x3a8] ss:$16 sps:$4 sm:$0xff]  }
  0x59   :  { %967 = vmatprep.subr.bf16.mxu1 %v2883_v4  ;;  %v2976_v4 = vld [vmem:[#allocation3 + $0x38c] ss:$16 sps:$4 sm:$0xff]  }
  0x5b   :  { %927 = vmatpush2.bf16.msra.mxu0 %v2885_v7  ;;  %v2979_v7 = vld [vmem:[#allocation3 + $0x16c] ss:$16 sps:$4 sm:$0xff]  }
  0x5c   :  { %968 = vmatpush2.bf16.msra.mxu1 %v2886_v8  ;;  %928 = vmatprep.subr.bf16.mxu0 %v2887_v10  ;;  %v2982_v8 = vld [vmem:[#allocation3 + $0x36c] ss:$16 sps:$4 sm:$0xff]   ;;  %v2980_v10 = vld [vmem:[#allocation3 + $0x368] ss:$16 sps:$4 sm:$0xff]  }
  0x5d   :  { %969 = vmatprep.subr.bf16.mxu1 %v2889_v11  ;;  %v2985_v11 = vld [vmem:[#allocation3 + $0x14c] ss:$16 sps:$4 sm:$0xff]  }
  0x5f   :  { %929 = vmatpush2.bf16.msra.mxu0 %v2891_v12  ;;  %v2988_v12 = vld [vmem:[#allocation3 + $0x34c] ss:$16 sps:$4 sm:$0xff]  }
  0x60   :  { %970 = vmatpush2.bf16.msra.mxu1 %v2892_v13  ;;  %930 = vmatprep.subr.bf16.mxu0 %v2893_v14  ;;  %v2983_v13 = vld [vmem:[#allocation3 + $0x148] ss:$16 sps:$4 sm:$0xff]  }
  0x61   :  { %971 = vmatprep.subr.bf16.mxu1 %v2895_v15  ;;  %v2986_v14 = vld [vmem:[#allocation3 + $0x348] ss:$16 sps:$4 sm:$0xff]   ;;  %v2991_v15 = vld [vmem:[#allocation3 + $0x12c] ss:$16 sps:$4 sm:$0xff]  }
  0x63   :  { %931 = vmatpush2.bf16.msra.mxu0 %v2897_v16  ;;  %v2994_v16 = vld [vmem:[#allocation3 + $0x32c] ss:$16 sps:$4 sm:$0xff]  }
  0x64   :  { %972 = vmatpush2.bf16.msra.mxu1 %v2898_v17  ;;  %982 = vmatprep.subr.bf16.mxu0 %v2907_v20  ;;  %v2989_v17 = vld [vmem:[#allocation3 + $0x128] ss:$16 sps:$4 sm:$0xff]   ;;  %v3000_v20 = vld [vmem:[#allocation3 + $0x30c] ss:$16 sps:$4 sm:$0xff]  }
  0x65   :  { %1023 = vmatprep.subr.bf16.mxu1 %v2910_v21  ;;  %v2995_v21 = vld [vmem:[#allocation3 + $0x108] ss:$16 sps:$4 sm:$0xff]  }
  0x66   :  { %933 = vmatmul.mubr.bf16.vlgmr.msra.gmra.mxu0 %v3361_v22 }
  0x67   :  { %974 = vmatmul.mubr.bf16.vlgmr.msra.gmra.mxu1 %v3363_v23  ;;  %983 = vmatpush1.bf16.msra.mxu0 %v2905_v24  ;;  %v2998_v24 = vld [vmem:[#allocation3 + $0x308] ss:$16 sps:$4 sm:$0xff]  }
  0x68   :  { %1024 = vmatpush1.bf16.msra.mxu1 %v2908_v25  ;;  %984 = vmatprep.subr.bf16.mxu0 %v2913_v26  ;;  %v3003_v25 = vld [vmem:[#allocation5 + $0xe4] ss:$16 sps:$4 sm:$0xff]   ;;  %v3001_v26 = vld [vmem:[#allocation5 + $0xe0] ss:$16 sps:$4 sm:$0xff]  }
  0x69   :  { %1025 = vmatprep.subr.bf16.mxu1 %v2916_v27  ;;  %1014 = vmatprep.mubr.bf16.mxu0 %v129_v6  ;;  %v2974_v6 = vld [vmem:[#allocation3 + $0x388] ss:$16 sps:$4 sm:$0xff]   ;;  %v3006_v27 = vld [vmem:[#allocation5 + $0xc4] ss:$16 sps:$4 sm:$0xff]  }
  0x6a   :  { %1055 = vmatprep.mubr.bf16.mxu1 %v131_v9  ;;  %v2977_v9 = vld [vmem:[#allocation3 + $0x168] ss:$16 sps:$4 sm:$0xff]  }
  0x6b   :  { %985 = vmatpush1.bf16.msra.mxu0 %v2911_v28  ;;  %v3004_v28 = vld [vmem:[#allocation5 + $0xc0] ss:$16 sps:$4 sm:$0xff]  }
  0x6c   :  { %1026 = vmatpush1.bf16.msra.mxu1 %v2914_v29  ;;  %986 = vmatprep.subr.bf16.mxu0 %v2919_v30  ;;  %v3009_v29 = vld [vmem:[#allocation5 + $0xa4] ss:$16 sps:$4 sm:$0xff]   ;;  %v3007_v30 = vld [vmem:[#allocation5 + $0xa0] ss:$16 sps:$4 sm:$0xff]  }
  0x6d   :  { %1027 = vmatprep.subr.bf16.mxu1 %v2922_v31  ;;  %v3012_v31 = vld [vmem:[#allocation5 + $0x84] ss:$16 sps:$4 sm:$0xff]  }
  0x6f   :  { %987 = vmatpush1.bf16.msra.mxu0 %v2917_v32  ;;  %v3010_v32 = vld [vmem:[#allocation5 + $0x80] ss:$16 sps:$4 sm:$0xff]  }
  0x70   :  { %1028 = vmatpush1.bf16.msra.mxu1 %v2920_v33  ;;  %988 = vmatprep.subr.bf16.mxu0 %v2925_v34  ;;  %v3051_v33 = vld [vmem:[#allocation5 + $0x2e4] ss:$16 sps:$4 sm:$0xff]  }
  0x71   :  { %1029 = vmatprep.subr.bf16.mxu1 %v2928_v35  ;;  %v3015_v34 = vld [vmem:[#allocation5 + $0x64] ss:$16 sps:$4 sm:$0xff]   ;;  %v3049_v35 = vld [vmem:[#allocation5 + $0x2e0] ss:$16 sps:$4 sm:$0xff]  }
  0x73   :  { %989 = vmatpush1.bf16.msra.mxu0 %v2923_v36  ;;  %v3055_v36 = vld [vmem:[#allocation5 + $0x2c0] ss:$16 sps:$4 sm:$0xff]  }
  0x74   :  { %1030 = vmatpush1.bf16.msra.mxu1 %v2926_v37  ;;  %990 = vmatprep.subr.bf16.mxu0 %v2931_v38  ;;  %v3018_v37 = vld [vmem:[#allocation5 + $0x44] ss:$16 sps:$4 sm:$0xff]   ;;  %v3016_v38 = vld [vmem:[#allocation5 + $0x40] ss:$16 sps:$4 sm:$0xff]  }
  0x75   :  { %1031 = vmatprep.subr.bf16.mxu1 %v2934_v39  ;;  %v3061_v39 = vld [vmem:[#allocation5 + $0x2a0] ss:$16 sps:$4 sm:$0xff]  }
  0x77   :  { %991 = vmatpush1.bf16.msra.mxu0 %v2929_v40  ;;  %v3063_v40 = vld [vmem:[#allocation5 + $0x2a4] ss:$16 sps:$4 sm:$0xff]  }
  0x78   :  { %1032 = vmatpush1.bf16.msra.mxu1 %v2932_v41  ;;  %992 = vmatprep.subr.bf16.mxu0 %v2937_v42  ;;  %v3021_v41 = vld [vmem:[#allocation5 + $0x24] ss:$16 sps:$4 sm:$0xff]   ;;  %v3019_v42 = vld [vmem:[#allocation5 + $0x20] ss:$16 sps:$4 sm:$0xff]  }
  0x79   :  { %1033 = vmatprep.subr.bf16.mxu1 %v2940_v43  ;;  %v3067_v43 = vld [vmem:[#allocation5 + $0x280] ss:$16 sps:$4 sm:$0xff]  }
  0x7b   :  { %993 = vmatpush1.bf16.msra.mxu0 %v2935_v44  ;;  %v3069_v44 = vld [vmem:[#allocation5 + $0x284] ss:$16 sps:$4 sm:$0xff]  }
  0x7c   :  { %1034 = vmatpush1.bf16.msra.mxu1 %v2938_v45  ;;  %994 = vmatprep.subr.bf16.mxu0 %v2943_v47  ;;  %v3024_v45 = vld [vmem:[#allocation5 + $0x4] ss:$16 sps:$4 sm:$0xff]   ;;  %v3022_v47 = vld [vmem:[#allocation5] ss:$16 sps:$4 sm:$0xff]  }
  0x7d   :  { %1035 = vmatprep.subr.bf16.mxu1 %v2946_v48  ;;  %v3073_v48 = vld [vmem:[#allocation5 + $0x260] ss:$16 sps:$4 sm:$0xff]  }
  0x7f   :  { %995 = vmatpush1.bf16.msra.mxu0 %v2941_v49  ;;  %v3075_v49 = vld [vmem:[#allocation5 + $0x264] ss:$16 sps:$4 sm:$0xff]  }
  0x80   :  { %1036 = vmatpush1.bf16.msra.mxu1 %v2944_v50  ;;  %996 = vmatprep.subr.bf16.mxu0 %v2949_v51  ;;  %v3027_v50 = vld [vmem:[#allocation5 + $0x1e4] ss:$16 sps:$4 sm:$0xff]   ;;  %v3025_v51 = vld [vmem:[#allocation5 + $0x1e0] ss:$16 sps:$4 sm:$0xff]  }
  0x81   :  { %1037 = vmatprep.subr.bf16.mxu1 %v2952_v52  ;;  %v3079_v52 = vld [vmem:[#allocation5 + $0x240] ss:$16 sps:$4 sm:$0xff]  }
  0x83   :  { %997 = vmatpush1.bf16.msra.mxu0 %v2947_v53  ;;  %v3081_v53 = vld [vmem:[#allocation5 + $0x244] ss:$16 sps:$4 sm:$0xff]  }
  0x84   :  { %1038 = vmatpush1.bf16.msra.mxu1 %v2950_v54  ;;  %998 = vmatprep.subr.bf16.mxu0 %v2955_v55  ;;  %v3030_v54 = vld [vmem:[#allocation5 + $0x1c4] ss:$16 sps:$4 sm:$0xff]   ;;  %v3028_v55 = vld [vmem:[#allocation5 + $0x1c0] ss:$16 sps:$4 sm:$0xff]  }
  0x85   :  { %1039 = vmatprep.subr.bf16.mxu1 %v2958_v56  ;;  %v3085_v56 = vld [vmem:[#allocation5 + $0x220] ss:$16 sps:$4 sm:$0xff]  }
  0x87   :  { %999 = vmatpush2.bf16.msra.mxu0 %v2953_v57  ;;  %v3087_v57 = vld [vmem:[#allocation5 + $0x224] ss:$16 sps:$4 sm:$0xff]  }
  0x88   :  { %1040 = vmatpush2.bf16.msra.mxu1 %v2956_v58  ;;  %1000 = vmatprep.subr.bf16.mxu0 %v2961_v59  ;;  %v3033_v58 = vld [vmem:[#allocation5 + $0x1a4] ss:$16 sps:$4 sm:$0xff]   ;;  %v3031_v59 = vld [vmem:[#allocation5 + $0x1a0] ss:$16 sps:$4 sm:$0xff]  }
  0x89   :  { %1041 = vmatprep.subr.bf16.mxu1 %v2964_v60  ;;  %v3091_v60 = vld [vmem:[#allocation5 + $0x200] ss:$16 sps:$4 sm:$0xff]  }
  0x8b   :  { %1001 = vmatpush2.bf16.msra.mxu0 %v2959_v61  ;;  %v3093_v61 = vld [vmem:[#allocation5 + $0x204] ss:$16 sps:$4 sm:$0xff]  }
  0x8c   :  { %1042 = vmatpush2.bf16.msra.mxu1 %v2962_v62  ;;  %1002 = vmatprep.subr.bf16.mxu0 %v2967_v63  ;;  %v3036_v62 = vld [vmem:[#allocation5 + $0x184] ss:$16 sps:$4 sm:$0xff]   ;;  %v3034_v63 = vld [vmem:[#allocation5 + $0x180] ss:$16 sps:$4 sm:$0xff]  }
  0x8d   :  { %1043 = vmatprep.subr.bf16.mxu1 %v2970_v0  ;;  %v3097_v0 = vld [vmem:[#allocation5 + $0x3e0] ss:$16 sps:$4 sm:$0xff]  }
  0x8f   :  { %1003 = vmatpush2.bf16.msra.mxu0 %v2965_v1  ;;  %v3099_v1 = vld [vmem:[#allocation5 + $0x3e4] ss:$16 sps:$4 sm:$0xff]  }
  0x90   :  { %1044 = vmatpush2.bf16.msra.mxu1 %v2968_v2  ;;  %1004 = vmatprep.subr.bf16.mxu0 %v2973_v3  ;;  %v3039_v2 = vld [vmem:[#allocation5 + $0x164] ss:$16 sps:$4 sm:$0xff]   ;;  %v3037_v3 = vld [vmem:[#allocation5 + $0x160] ss:$16 sps:$4 sm:$0xff]  }
  0x91   :  { %1045 = vmatprep.subr.bf16.mxu1 %v2976_v4  ;;  %v3103_v4 = vld [vmem:[#allocation5 + $0x3c0] ss:$16 sps:$4 sm:$0xff]  }
  0x93   :  { %1005 = vmatpush2.bf16.msra.mxu0 %v2971_v5  ;;  %v3105_v5 = vld [vmem:[#allocation5 + $0x3c4] ss:$16 sps:$4 sm:$0xff]  }
  0x94   :  { %1046 = vmatpush2.bf16.msra.mxu1 %v2974_v6  ;;  %1006 = vmatprep.subr.bf16.mxu0 %v2979_v7  ;;  %v3042_v6 = vld [vmem:[#allocation5 + $0x144] ss:$16 sps:$4 sm:$0xff]   ;;  %v3040_v7 = vld [vmem:[#allocation5 + $0x140] ss:$16 sps:$4 sm:$0xff]  }
  0x95   :  { %1047 = vmatprep.subr.bf16.mxu1 %v2982_v8  ;;  %v3109_v8 = vld [vmem:[#allocation5 + $0x3a0] ss:$16 sps:$4 sm:$0xff]  }
  0x97   :  { %1007 = vmatpush2.bf16.msra.mxu0 %v2977_v9  ;;  %v3111_v9 = vld [vmem:[#allocation5 + $0x3a4] ss:$16 sps:$4 sm:$0xff]  }
  0x98   :  { %1048 = vmatpush2.bf16.msra.mxu1 %v2980_v10  ;;  %1008 = vmatprep.subr.bf16.mxu0 %v2985_v11  ;;  %v3045_v10 = vld [vmem:[#allocation5 + $0x124] ss:$16 sps:$4 sm:$0xff]   ;;  %v3043_v11 = vld [vmem:[#allocation5 + $0x120] ss:$16 sps:$4 sm:$0xff]  }
  0x99   :  { %1049 = vmatprep.subr.bf16.mxu1 %v2988_v12  ;;  %v3115_v12 = vld [vmem:[#allocation5 + $0x380] ss:$16 sps:$4 sm:$0xff]  }
  0x9b   :  { %1009 = vmatpush2.bf16.msra.mxu0 %v2983_v13  ;;  %v3117_v13 = vld [vmem:[#allocation5 + $0x384] ss:$16 sps:$4 sm:$0xff]  }
  0x9c   :  { %1050 = vmatpush2.bf16.msra.mxu1 %v2986_v14  ;;  %1010 = vmatprep.subr.bf16.mxu0 %v2991_v15  ;;  %v3048_v14 = vld [vmem:[#allocation5 + $0x104] ss:$16 sps:$4 sm:$0xff]   ;;  %v3046_v15 = vld [vmem:[#allocation5 + $0x100] ss:$16 sps:$4 sm:$0xff]  }
  0x9d   :  { %1051 = vmatprep.subr.bf16.mxu1 %v2994_v16  ;;  %v3121_v16 = vld [vmem:[#allocation5 + $0x360] ss:$16 sps:$4 sm:$0xff]  }
  0x9f   :  { %1011 = vmatpush2.bf16.msra.mxu0 %v2989_v17  ;;  %v3123_v17 = vld [vmem:[#allocation5 + $0x364] ss:$16 sps:$4 sm:$0xff]  }
  0xa0   :  { %1052 = vmatpush2.bf16.msra.mxu1 %v2992_v18  ;;  %1012 = vmatprep.subr.bf16.mxu0 %v2997_v19  ;;  %v3054_v18 = vld [vmem:[#allocation5 + $0xec] ss:$16 sps:$4 sm:$0xff]   ;;  %v3127_v19 = vld [vmem:[#allocation5 + $0x340] ss:$16 sps:$4 sm:$0xff]  }
  0xa1   :  { %1053 = vmatprep.subr.bf16.mxu1 %v3000_v20  ;;  %v3129_v20 = vld [vmem:[#allocation5 + $0x344] ss:$16 sps:$4 sm:$0xff]  }
  0xa3   :  { %1013 = vmatpush2.bf16.msra.mxu0 %v2995_v21  ;;  %v3135_v21 = vld [vmem:[#allocation5 + $0x324] ss:$16 sps:$4 sm:$0xff]  }
  0xa4   :  { %1054 = vmatpush2.bf16.msra.mxu1 %v2998_v24  ;;  %1903 = vmatprep.subr.bf16.mxu0 %v3003_v25  ;;  %v3133_v24 = vld [vmem:[#allocation5 + $0x320] ss:$16 sps:$4 sm:$0xff]   ;;  %v3141_v25 = vld [vmem:[#allocation5 + $0x304] ss:$16 sps:$4 sm:$0xff]  }
  0xa5   :  { %1944 = vmatprep.subr.bf16.mxu1 %v3051_v33 }
  0xa6   :  { %1015 = vmatmul.mubr.bf16.vlgmr.msra.gmra.mxu0 %v3361_v22  ;;  %v3013_v22 = vld [vmem:[#allocation5 + $0x60] ss:$16 sps:$4 sm:$0xff]  }
  0xa7   :  { %1056 = vmatmul.mubr.bf16.vlgmr.msra.gmra.mxu1 %v3363_v23  ;;  %1904 = vmatpush1.bf16.msra.mxu0 %v3001_v26  ;;  %v3057_v23 = vld [vmem:[#allocation5 + $0x2c4] ss:$16 sps:$4 sm:$0xff]   ;;  %v3139_v26 = vld [vmem:[#allocation5 + $0x300] ss:$16 sps:$4 sm:$0xff]  }
  0xa8   :  { %1905 = vmatprep.subr.bf16.mxu0 %v3006_v27  ;;  %1945 = vmatpush1.bf16.msra.mxu1 %v3049_v35  ;;  %v3147_v27 = vld [vmem:[#allocation5 + $0x2ec] ss:$16 sps:$4 sm:$0xff]  }
  0xa9   :  { %1946 = vmatprep.subr.bf16.mxu1 %v3057_v23 }
  0xab   :  { %1906 = vmatpush1.bf16.msra.mxu0 %v3004_v28  ;;  %v1083_v28 = vsub.s32 0, %v3346_v46 }
  0xac   :  { %1907 = vmatprep.subr.bf16.mxu0 %v3009_v29  ;;  %1947 = vmatpush1.bf16.msra.mxu1 %v3055_v36  ;;  %v3373_v29 = vld [vmem:[%s3417_s2] sm:$0xf] }
  0xad   :  { %1948 = vmatprep.subr.bf16.mxu1 %v3063_v40 }
  0xaf   :  { %1908 = vmatpush1.bf16.msra.mxu0 %v3007_v30  ;;  %v1087_v30 = vsub.s32 1, %v3346_v46 }
  0xb0   :  { %1909 = vmatprep.subr.bf16.mxu0 %v3012_v31  ;;  %1949 = vmatpush1.bf16.msra.mxu1 %v3061_v39  ;;  %v1084_v31 = vrot.slane %v3373_v29, %v1083_v28 }
  0xb1   :  { %1950 = vmatprep.subr.bf16.mxu1 %v3069_v44  ;;  %v1088_v35 = vrot.slane %v3373_v29, %v1087_v30 }
  0xb3   :  { %1910 = vmatpush1.bf16.msra.mxu0 %v3010_v32 }
  0xb4   :  { %1911 = vmatprep.subr.bf16.mxu0 %v3015_v34  ;;  %1951 = vmatpush1.bf16.msra.mxu1 %v3067_v43 }
  0xb5   :  { %1952 = vmatprep.subr.bf16.mxu1 %v3075_v49  ;;  %v3060_v49 = vld [vmem:[#allocation5 + $0xcc] ss:$16 sps:$4 sm:$0xff]  }
  0xb7   :  { %1912 = vmatpush1.bf16.msra.mxu0 %v3013_v22 }
  0xb8   :  { %1913 = vmatprep.subr.bf16.mxu0 %v3018_v37  ;;  %1953 = vmatpush1.bf16.msra.mxu1 %v3073_v48 }
  0xb9   :  { %1954 = vmatprep.subr.bf16.mxu1 %v3081_v53  ;;  %v3072_v53 = vld [vmem:[#allocation5 + $0x8c] ss:$16 sps:$4 sm:$0xff]  }
  0xbb   :  { %1914 = vmatpush1.bf16.msra.mxu0 %v3016_v38 }
  0xbc   :  { %1915 = vmatprep.subr.bf16.mxu0 %v3021_v41  ;;  %1955 = vmatpush1.bf16.msra.mxu1 %v3079_v52  ;;  %v3064_v52 = vld [vmem:[#allocation5 + $0xa8] ss:$16 sps:$4 sm:$0xff]  }
  0xbd   :  { %1956 = vmatprep.subr.bf16.mxu1 %v3087_v57  ;;  %v3084_v57 = vld [vmem:[#allocation5 + $0x4c] ss:$16 sps:$4 sm:$0xff]  }
  0xbf   :  { %1916 = vmatpush1.bf16.msra.mxu0 %v3019_v42 }
  0xc0   :  { %1917 = vmatprep.subr.bf16.mxu0 %v3024_v45  ;;  %1957 = vmatpush1.bf16.msra.mxu1 %v3085_v56  ;;  %v3076_v56 = vld [vmem:[#allocation5 + $0x68] ss:$16 sps:$4 sm:$0xff]  }
  0xc1   :  { %1958 = vmatprep.subr.bf16.mxu1 %v3093_v61  ;;  %v3096_v61 = vld [vmem:[#allocation5 + $0xc] ss:$16 sps:$4 sm:$0xff]  }
  0xc3   :  { %1918 = vmatpush1.bf16.msra.mxu0 %v3022_v47  ;;  %v3052_v47 = vld [vmem:[#allocation5 + $0xe8] ss:$16 sps:$4 sm:$0xff]  }
  0xc4   :  { %1919 = vmatprep.subr.bf16.mxu0 %v3027_v50  ;;  %1959 = vmatpush1.bf16.msra.mxu1 %v3091_v60  ;;  %v3058_v50 = vld [vmem:[#allocation5 + $0xc8] ss:$16 sps:$4 sm:$0xff]  }
  0xc5   :  { %1960 = vmatprep.subr.bf16.mxu1 %v3099_v1  ;;  %v3088_v60 = vld [vmem:[#allocation5 + $0x28] ss:$16 sps:$4 sm:$0xff]   ;;  %v3108_v1 = vld [vmem:[#allocation5 + $0x1cc] ss:$16 sps:$4 sm:$0xff]  }
  0xc7   :  { %1920 = vmatpush2.bf16.msra.mxu0 %v3025_v51  ;;  %v3066_v51 = vld [vmem:[#allocation5 + $0xac] ss:$16 sps:$4 sm:$0xff]  }
  0xc8   :  { %1921 = vmatprep.subr.bf16.mxu0 %v3030_v54  ;;  %1961 = vmatpush2.bf16.msra.mxu1 %v3097_v0  ;;  %v3070_v54 = vld [vmem:[#allocation5 + $0x88] ss:$16 sps:$4 sm:$0xff]  }
  0xc9   :  { %1962 = vmatprep.subr.bf16.mxu1 %v3105_v5  ;;  %v3100_v0 = vld [vmem:[#allocation5 + $0x1e8] ss:$16 sps:$4 sm:$0xff]   ;;  %v3120_v5 = vld [vmem:[#allocation5 + $0x18c] ss:$16 sps:$4 sm:$0xff]  }
  0xcb   :  { %1922 = vmatpush2.bf16.msra.mxu0 %v3028_v55  ;;  %v3078_v55 = vld [vmem:[#allocation5 + $0x6c] ss:$16 sps:$4 sm:$0xff]  }
  0xcc   :  { %1923 = vmatprep.subr.bf16.mxu0 %v3033_v58  ;;  %1963 = vmatpush2.bf16.msra.mxu1 %v3103_v4  ;;  %v3082_v58 = vld [vmem:[#allocation5 + $0x48] ss:$16 sps:$4 sm:$0xff]  }
  0xcd   :  { %1964 = vmatprep.subr.bf16.mxu1 %v3111_v9  ;;  %v3112_v4 = vld [vmem:[#allocation5 + $0x1a8] ss:$16 sps:$4 sm:$0xff]   ;;  %v3132_v9 = vld [vmem:[#allocation5 + $0x14c] ss:$16 sps:$4 sm:$0xff]  }
  0xcf   :  { %1924 = vmatpush2.bf16.msra.mxu0 %v3031_v59  ;;  %v3090_v59 = vld [vmem:[#allocation5 + $0x2c] ss:$16 sps:$4 sm:$0xff]  }
  0xd0   :  { %1925 = vmatprep.subr.bf16.mxu0 %v3036_v62  ;;  %1965 = vmatpush2.bf16.msra.mxu1 %v3109_v8  ;;  %v3094_v62 = vld [vmem:[#allocation5 + $0x8] ss:$16 sps:$4 sm:$0xff]  }
  0xd1   :  { %1966 = vmatprep.subr.bf16.mxu1 %v3117_v13  ;;  %v3124_v8 = vld [vmem:[#allocation5 + $0x168] ss:$16 sps:$4 sm:$0xff]   ;;  %v3138_v13 = vld [vmem:[#allocation5 + $0x12c] ss:$16 sps:$4 sm:$0xff]  }
  0xd3   :  { %1926 = vmatpush2.bf16.msra.mxu0 %v3034_v63  ;;  %v3102_v63 = vld [vmem:[#allocation5 + $0x1ec] ss:$16 sps:$4 sm:$0xff]  }
  0xd4   :  { %1927 = vmatprep.subr.bf16.mxu0 %v3039_v2  ;;  %1967 = vmatpush2.bf16.msra.mxu1 %v3115_v12  ;;  %v3106_v2 = vld [vmem:[#allocation5 + $0x1c8] ss:$16 sps:$4 sm:$0xff]   ;;  %v1095_v12 = vsub.s32 3, %v3346_v46 }
  0xd5   :  { %1968 = vmatprep.subr.bf16.mxu1 %v3123_v17 }
  0xd7   :  { %1928 = vmatpush2.bf16.msra.mxu0 %v3037_v3  ;;  %v3114_v3 = vld [vmem:[#allocation5 + $0x1ac] ss:$16 sps:$4 sm:$0xff]  }
  0xd8   :  { %1929 = vmatprep.subr.bf16.mxu0 %v3042_v6  ;;  %1969 = vmatpush2.bf16.msra.mxu1 %v3121_v16  ;;  %v3118_v6 = vld [vmem:[#allocation5 + $0x188] ss:$16 sps:$4 sm:$0xff]  }
  0xd9   :  { %1970 = vmatprep.subr.bf16.mxu1 %v3129_v20 }
  0xdb   :  { %1930 = vmatpush2.bf16.msra.mxu0 %v3040_v7  ;;  %v3126_v7 = vld [vmem:[#allocation5 + $0x16c] ss:$16 sps:$4 sm:$0xff]  }
  0xdc   :  { %1931 = vmatprep.subr.bf16.mxu0 %v3045_v10  ;;  %1971 = vmatpush2.bf16.msra.mxu1 %v3127_v19  ;;  %v1091_v10 = vsub.s32 2, %v3346_v46  ;;  %v3136_v19 = vld [vmem:[#allocation5 + $0x128] ss:$16 sps:$4 sm:$0xff]  }
  0xdd   :  { %1972 = vmatprep.subr.bf16.mxu1 %v3135_v21 }
  0xdf   :  { %1932 = vmatpush2.bf16.msra.mxu0 %v3043_v11  ;;  %v3130_v11 = vld [vmem:[#allocation5 + $0x148] ss:$16 sps:$4 sm:$0xff]  }
  0xe0   :  { %1933 = vmatprep.subr.bf16.mxu0 %v3048_v14  ;;  %1973 = vmatpush2.bf16.msra.mxu1 %v3133_v24  ;;  %v1092_v14 = vrot.slane %v3373_v29, %v1091_v10  ;;  %v3144_v24 = vld [vmem:[#allocation5 + $0x10c] ss:$16 sps:$4 sm:$0xff]  }
  0xe1   :  { %1974 = vmatprep.subr.bf16.mxu1 %v3141_v25 }
  0xe3   :  { %1934 = vmatpush2.bf16.msra.mxu0 %v3046_v15 }
  0xe4   :  { %1985 = vmatprep.subr.bf16.mxu0 %v3054_v18  ;;  %1975 = vmatpush2.bf16.msra.mxu1 %v3139_v26  ;;  %v1096_v18 = vrot.slane %v3373_v29, %v1095_v12  ;;  %v3145_v29 = vld [vmem:[#allocation5 + $0x2e8] ss:$16 sps:$4 sm:$0xff]  }
  0xe5   :  { %2026 = vmatprep.subr.bf16.mxu1 %v3147_v27 }
 0x126   :  { %v934_v32 = vpop.f32.mrf.mxu0 }
 0x127   :  { %v975_v33 = vpop.f32.mrf.mxu1 }
 0x128   :  { %v976_v34 = vadd.f32 %v975_v33, %v934_v32  ;;  %v936_v22 = vpop.f32.mrf.mxu0  ;;  %v3142_v33 = vld [vmem:[#allocation5 + $0x108] ss:$16 sps:$4 sm:$0xff]  }
 0x129   :  { %v977_v36 = vpop.f32.mrf.mxu1 }
 0x12a   :  { %v1101_v23 = vadd.f32 %v1084_v31, %v976_v34  ;;  %v978_v37 = vadd.f32 %v977_v36, %v936_v22  ;;  %v938_v38 = vpop.f32.mrf.mxu0 }
 0x12b   :  { %v979_v39 = vpop.f32.mrf.mxu1  ;;  %v3150_v38 = vld [vmem:[#allocation5 + $0x2cc] ss:$16 sps:$4 sm:$0xff]  }
 0x12c   :  { %v1102_v40 = vadd.f32 %v1088_v35, %v978_v37  ;;  %v1105_v41 = vmax.f32 %v1101_v23, 0.0  ;;  %v939_v42 = vpop.f32.mrf.mxu0  ;;  %v3148_v39 = vld [vmem:[#allocation5 + $0x2c8] ss:$16 sps:$4 sm:$0xff]  }
 0x12d   :  { %v980_v43 = vpop.f32.mrf.mxu1  ;;  %v3156_v42 = vld [vmem:[#allocation5 + $0x28c] ss:$16 sps:$4 sm:$0xff]  }
 0x12e   :  { %v1106_v44 = vmax.f32 %v1102_v40, 0.0  ;;  %v3382_v48 = vpack.c.bf16 %v1105_v41, %v1105_v41  ;;  %v3153_v40 = vld [vmem:[#allocation5 + $0x2ac] ss:$16 sps:$4 sm:$0xff]   ;;  %v3151_v41 = vld [vmem:[#allocation5 + $0x2a8] ss:$16 sps:$4 sm:$0xff]  }
 0x12f   :  { %v3193_v43 = vld [vmem:[#allocation7 + $0x78] sm:$0xff]  }
 0x130   :  { %v1110_v45 = vpack.c.bf16 %v1106_v44, %v1106_v44  ;;  %v3194_v44 = vld [vmem:[#allocation7 + $0x38] sm:$0xff]  }
 0x132   :  { %1935 = vmatprep.mubr.bf16.mxu0 %v1110_v45 }
 0x133   :  { %1936 = vmatmul.mubr.bf16.vlgmr.msra.gmra.mxu0 %v3382_v48 }
 0x134   :  { %1986 = vmatpush1.bf16.msra.mxu0 %v3052_v47  ;;  %2017 = vmatprep.mubr.bf16.mxu0 %v1110_v45  ;;  %v3195_v45 = vld [vmem:[#allocation7 + $0x70] sm:$0xff]   ;;  %v3154_v47 = vld [vmem:[#allocation5 + $0x288] ss:$16 sps:$4 sm:$0xff]  }
 0x135   :  { %1987 = vmatprep.subr.bf16.mxu0 %v3060_v49  ;;  %v3196_v49 = vld [vmem:[#allocation7 + $0x30] sm:$0xff]  }
 0x138   :  { %1988 = vmatpush1.bf16.msra.mxu0 %v3058_v50  ;;  %v3197_v50 = vld [vmem:[#allocation7 + $0x68] sm:$0xff]  }
 0x139   :  { %1989 = vmatprep.subr.bf16.mxu0 %v3066_v51  ;;  %v3157_v51 = vld [vmem:[#allocation5 + $0x268] ss:$16 sps:$4 sm:$0xff]  }
 0x13c   :  { %1990 = vmatpush1.bf16.msra.mxu0 %v3064_v52  ;;  %v3198_v52 = vld [vmem:[#allocation7 + $0x28] sm:$0xff]  }
 0x13d   :  { %1991 = vmatprep.subr.bf16.mxu0 %v3072_v53  ;;  %v3162_v53 = vld [vmem:[#allocation5 + $0x24c] ss:$16 sps:$4 sm:$0xff]  }
 0x140   :  { %1992 = vmatpush1.bf16.msra.mxu0 %v3070_v54  ;;  %v3199_v54 = vld [vmem:[#allocation7 + $0x60] sm:$0xff]  }
 0x141   :  { %1993 = vmatprep.subr.bf16.mxu0 %v3078_v55  ;;  %v3160_v55 = vld [vmem:[#allocation5 + $0x248] ss:$16 sps:$4 sm:$0xff]  }
 0x144   :  { %1994 = vmatpush1.bf16.msra.mxu0 %v3076_v56  ;;  %v3200_v56 = vld [vmem:[#allocation7 + $0x20] sm:$0xff]  }
 0x145   :  { %1995 = vmatprep.subr.bf16.mxu0 %v3084_v57  ;;  %v3165_v57 = vld [vmem:[#allocation5 + $0x22c] ss:$16 sps:$4 sm:$0xff]  }
 0x148   :  { %1996 = vmatpush1.bf16.msra.mxu0 %v3082_v58  ;;  %v3201_v58 = vld [vmem:[#allocation7 + $0x58] sm:$0xff]  }
 0x149   :  { %1997 = vmatprep.subr.bf16.mxu0 %v3090_v59  ;;  %v3163_v59 = vld [vmem:[#allocation5 + $0x228] ss:$16 sps:$4 sm:$0xff]  }
 0x14c   :  { %1998 = vmatpush1.bf16.msra.mxu0 %v3088_v60  ;;  %v3202_v60 = vld [vmem:[#allocation7 + $0x18] sm:$0xff]  }
 0x14d   :  { %1999 = vmatprep.subr.bf16.mxu0 %v3096_v61  ;;  %v3168_v61 = vld [vmem:[#allocation5 + $0x20c] ss:$16 sps:$4 sm:$0xff]  }
 0x150   :  { %2000 = vmatpush1.bf16.msra.mxu0 %v3094_v62  ;;  %v3203_v62 = vld [vmem:[#allocation7 + $0x50] sm:$0xff]  }
 0x151   :  { %2001 = vmatprep.subr.bf16.mxu0 %v3102_v63  ;;  %v3166_v63 = vld [vmem:[#allocation5 + $0x208] ss:$16 sps:$4 sm:$0xff]  }
 0x154   :  { %2002 = vmatpush2.bf16.msra.mxu0 %v3100_v0  ;;  %v3171_v0 = vld [vmem:[#allocation5 + $0x3ec] ss:$16 sps:$4 sm:$0xff]  }
 0x155   :  { %2003 = vmatprep.subr.bf16.mxu0 %v3108_v1  ;;  %v3169_v1 = vld [vmem:[#allocation5 + $0x3e8] ss:$16 sps:$4 sm:$0xff]  }
 0x158   :  { %2004 = vmatpush2.bf16.msra.mxu0 %v3106_v2  ;;  %v3174_v2 = vld [vmem:[#allocation5 + $0x3cc] ss:$16 sps:$4 sm:$0xff]  }
 0x159   :  { %2005 = vmatprep.subr.bf16.mxu0 %v3114_v3  ;;  %v3172_v3 = vld [vmem:[#allocation5 + $0x3c8] ss:$16 sps:$4 sm:$0xff]  }
 0x15c   :  { %2006 = vmatpush2.bf16.msra.mxu0 %v3112_v4  ;;  %v3177_v4 = vld [vmem:[#allocation5 + $0x3ac] ss:$16 sps:$4 sm:$0xff]  }
 0x15d   :  { %2007 = vmatprep.subr.bf16.mxu0 %v3120_v5  ;;  %v3175_v5 = vld [vmem:[#allocation5 + $0x3a8] ss:$16 sps:$4 sm:$0xff]  }
 0x160   :  { %2008 = vmatpush2.bf16.msra.mxu0 %v3118_v6  ;;  %v3180_v6 = vld [vmem:[#allocation5 + $0x38c] ss:$16 sps:$4 sm:$0xff]  }
 0x161   :  { %2009 = vmatprep.subr.bf16.mxu0 %v3126_v7  ;;  %v3178_v7 = vld [vmem:[#allocation5 + $0x388] ss:$16 sps:$4 sm:$0xff]  }
 0x164   :  { %2010 = vmatpush2.bf16.msra.mxu0 %v3124_v8  ;;  %v3183_v8 = vld [vmem:[#allocation5 + $0x36c] ss:$16 sps:$4 sm:$0xff]  }
 0x165   :  { %2011 = vmatprep.subr.bf16.mxu0 %v3132_v9  ;;  %v3181_v9 = vld [vmem:[#allocation5 + $0x368] ss:$16 sps:$4 sm:$0xff]  }
 0x166   :  { %v1016_v15 = vpop.f32.mrf.mxu0 }
 0x167   :  { %v1057_v16 = vpop.f32.mrf.mxu1 }
 0x168   :  { %v1058_v17 = vadd.f32 %v1057_v16, %v1016_v15  ;;  %2012 = vmatpush2.bf16.msra.mxu0 %v3130_v11  ;;  %v1018_v20 = vpop.f32.mrf.mxu0  ;;  %v3186_v11 = vld [vmem:[#allocation5 + $0x34c] ss:$16 sps:$4 sm:$0xff]   ;;  %v3187_v15 = vld [vmem:[#allocation5 + $0x328] ss:$16 sps:$4 sm:$0xff]  }
 0x169   :  { %v1059_v21 = vpop.f32.mrf.mxu1  ;;  %2013 = vmatprep.subr.bf16.mxu0 %v3138_v13  ;;  %v3184_v13 = vld [vmem:[#allocation5 + $0x348] ss:$16 sps:$4 sm:$0xff]   ;;  %v3192_v16 = vld [vmem:[#allocation5 + $0x30c] ss:$16 sps:$4 sm:$0xff]  }
 0x16a   :  { %v1103_v25 = vadd.f32 %v1092_v14, %v1058_v17  ;;  %v1060_v26 = vadd.f32 %v1059_v21, %v1018_v20  ;;  %v1020_v27 = vpop.f32.mrf.mxu0  ;;  %v3189_v14 = vld [vmem:[#allocation5 + $0x32c] ss:$16 sps:$4 sm:$0xff]   ;;  %v3190_v17 = vld [vmem:[#allocation5 + $0x308] ss:$16 sps:$4 sm:$0xff]   ;;  %v3207_v21 = vld [vmem:[#allocation7 + $0x40] sm:$0xff]  }
 0x16b   :  { %v1061_v31 = vpop.f32.mrf.mxu1  ;;  %v3206_v20 = vld [vmem:[#allocation7 + $0x8] sm:$0xff]   ;;  %v3211_v27 = vld [vmem:[#allocation7 + $0xf0] sm:$0xff]  }
 0x16c   :  { %v1104_v32 = vadd.f32 %v1096_v18, %v1060_v26  ;;  %2014 = vmatpush2.bf16.msra.mxu0 %v3136_v19  ;;  %v1107_v34 = vmax.f32 %v1103_v25, 0.0  ;;  %v1021_v35 = vpop.f32.mrf.mxu0  ;;  %v3204_v18 = vld [vmem:[#allocation7 + $0x10] sm:$0xff]   ;;  %v3205_v19 = vld [vmem:[#allocation7 + $0x48] sm:$0xff]   ;;  %v3209_v25 = vld [vmem:[#allocation7 + $0xf8] sm:$0xff]  }
 0x16d   :  { %v1062_v22 = vpop.f32.mrf.mxu1  ;;  %2015 = vmatprep.subr.bf16.mxu0 %v3144_v24  ;;  %v3208_v24 = vld [vmem:[#allocation7] sm:$0xff]   ;;  %v3210_v26 = vld [vmem:[#allocation7 + $0xb8] sm:$0xff]   ;;  %v3212_v31 = vld [vmem:[#allocation7 + $0xb0] sm:$0xff]  }
 0x16e   :  { %v1108_v36 = vmax.f32 %v1104_v32, 0.0  ;;  %v3393_v37 = vpack.c.bf16 %v1107_v34, %v1107_v34  ;;  %v3213_v32 = vld [vmem:[#allocation7 + $0xe8] sm:$0xff]   ;;  %v3215_v34 = vld [vmem:[#allocation7 + $0xe0] sm:$0xff]   ;;  %v3217_v22 = vld [vmem:[#allocation7 + $0xd8] sm:$0xff]  }
 0x16f   :  { %v3216_v35 = vld [vmem:[#allocation7 + $0xa0] sm:$0xff]  }
 0x170   :  { %v1112_v23 = vpack.c.bf16 %v1108_v36, %v1108_v36  ;;  %2016 = vmatpush2.bf16.msra.mxu0 %v3142_v33  ;;  %v3214_v33 = vld [vmem:[#allocation7 + $0xa8] sm:$0xff]   ;;  %v3218_v36 = vld [vmem:[#allocation7 + $0x98] sm:$0xff]  }
 0x171   :  { %2751 = vmatprep.subr.bf16.mxu0 %v3193_v43  ;;  %v3224_v43 = vld [vmem:[#allocation7 + $0x80] sm:$0xff]  }
 0x172   :  { %1976 = vmatprep.mubr.bf16.mxu1 %v1112_v23 }
 0x173   :  { %2018 = vmatmul.mubr.bf16.vlgmr.msra.gmra.mxu0 %v3382_v48  ;;  %1977 = vmatmul.mubr.bf16.vlgmr.msra.gmra.mxu1 %v3393_v37  ;;  %v3159_v48 = vld [vmem:[#allocation5 + $0x26c] ss:$16 sps:$4 sm:$0xff]  }
 0x174   :  { %2027 = vmatpush1.bf16.msra.mxu1 %v3145_v29  ;;  %2058 = vmatprep.mubr.bf16.mxu1 %v1112_v23  ;;  %v3219_v23 = vld [vmem:[#allocation7 + $0xd0] sm:$0xff]  }
 0x175   :  { %2028 = vmatprep.subr.bf16.mxu1 %v3150_v38  ;;  %2752 = vmatpush3.bf16.msra.mxu0 %v3194_v44  ;;  %v3220_v29 = vld [vmem:[#allocation7 + $0x90] sm:$0xff]   ;;  %v3221_v38 = vld [vmem:[#allocation7 + $0xc8] sm:$0xff]  }
 0x176   :  { %2753 = vmatprep.subr.bf16.mxu0 %v3195_v45  ;;  %v1241_v45 = vld [vmem:[%s3419_s4] sm:$0xf] }
 0x178   :  { %2029 = vmatpush1.bf16.msra.mxu1 %v3148_v39  ;;  %v3222_v39 = vld [vmem:[#allocation7 + $0x88] sm:$0xff]  }
 0x179   :  { %2030 = vmatprep.subr.bf16.mxu1 %v3153_v40  ;;  %2754 = vmatpush3.bf16.msra.mxu0 %v3196_v49  ;;  %v1250_v49 = vrot.slane %v1241_v45, %v1087_v30  ;;  %v1258_v30 = vrot.slane %v1241_v45, %v1095_v12  ;;  %v2718_v12 = vld [vmem:[%s3421_s6] ss:$0 sm:$0xff] }
 0x17a   :  { %2755 = vmatprep.subr.bf16.mxu0 %v3197_v50 }
 0x17c   :  { %2031 = vmatpush1.bf16.msra.mxu1 %v3151_v41 }
 0x17d   :  { %2032 = vmatprep.subr.bf16.mxu1 %v3156_v42  ;;  %2756 = vmatpush3.bf16.msra.mxu0 %v3198_v52  ;;  %v3223_v42 = vld [vmem:[#allocation7 + $0xc0] sm:$0xff]  }
 0x17e   :  { %2757 = vmatprep.subr.bf16.mxu0 %v3199_v54 }
 0x180   :  { %2033 = vmatpush1.bf16.msra.mxu1 %v3154_v47  ;;  %v1246_v47 = vrot.slane %v1241_v45, %v1083_v28  ;;  %v1254_v28 = vrot.slane %v1241_v45, %v1091_v10 }
 0x181   :  { %2034 = vmatprep.subr.bf16.mxu1 %v3159_v48  ;;  %2758 = vmatpush3.bf16.msra.mxu0 %v3200_v56 }
 0x182   :  { %2759 = vmatprep.subr.bf16.mxu0 %v3201_v58 }
 0x184   :  { %2035 = vmatpush1.bf16.msra.mxu1 %v3157_v51 }
 0x185   :  { %2036 = vmatprep.subr.bf16.mxu1 %v3162_v53  ;;  %2760 = vmatpush3.bf16.msra.mxu0 %v3202_v60 }
 0x186   :  { %2761 = vmatprep.subr.bf16.mxu0 %v3203_v62 }
 0x188   :  { %2037 = vmatpush1.bf16.msra.mxu1 %v3160_v55 }
 0x189   :  { %2038 = vmatprep.subr.bf16.mxu1 %v3165_v57  ;;  %2762 = vmatpush3.bf16.msra.mxu0 %v3204_v18 }
 0x18a   :  { %2763 = vmatprep.subr.bf16.mxu0 %v3205_v19 }
 0x18c   :  { %2039 = vmatpush1.bf16.msra.mxu1 %v3163_v59 }
 0x18d   :  { %2040 = vmatprep.subr.bf16.mxu1 %v3168_v61  ;;  %2764 = vmatpush3.bf16.msra.mxu0 %v3206_v20 }
 0x18e   :  { %2765 = vmatprep.subr.bf16.mxu0 %v3207_v21 }
 0x190   :  { %2041 = vmatpush1.bf16.msra.mxu1 %v3166_v63 }
 0x191   :  { %2042 = vmatprep.subr.bf16.mxu1 %v3171_v0  ;;  %2766 = vmatpush3.bf16.msra.mxu0 %v3208_v24 }
 0x194   :  { %2043 = vmatpush2.bf16.msra.mxu1 %v3169_v1 }
 0x195   :  { %2044 = vmatprep.subr.bf16.mxu1 %v3174_v2 }
 0x198   :  { %2045 = vmatpush2.bf16.msra.mxu1 %v3172_v3 }
 0x199   :  { %2046 = vmatprep.subr.bf16.mxu1 %v3177_v4 }
 0x19c   :  { %2047 = vmatpush2.bf16.msra.mxu1 %v3175_v5 }
 0x19d   :  { %2048 = vmatprep.subr.bf16.mxu1 %v3180_v6 }
 0x1a0   :  { %2049 = vmatpush2.bf16.msra.mxu1 %v3178_v7 }
 0x1a1   :  { %2050 = vmatprep.subr.bf16.mxu1 %v3183_v8 }
 0x1a4   :  { %2051 = vmatpush2.bf16.msra.mxu1 %v3181_v9 }
 0x1a5   :  { %2052 = vmatprep.subr.bf16.mxu1 %v3186_v11 }
 0x1a8   :  { %2053 = vmatpush2.bf16.msra.mxu1 %v3184_v13 }
 0x1a9   :  { %2054 = vmatprep.subr.bf16.mxu1 %v3189_v14 }
 0x1ac   :  { %2055 = vmatpush2.bf16.msra.mxu1 %v3187_v15 }
 0x1ad   :  { %2056 = vmatprep.subr.bf16.mxu1 %v3192_v16 }
 0x1b0   :  { %2057 = vmatpush2.bf16.msra.mxu1 %v3190_v17 }
 0x1b1   :  { %2773 = vmatprep.subr.bf16.mxu1 %v3209_v25 }
 0x1b3   :  { %2059 = vmatmul.mubr.bf16.vlgmr.msra.gmra.mxu1 %v3393_v37 }
 0x1b4   :  { %2774 = vmatpush3.bf16.msra.mxu1 %v3210_v26 }
 0x1b5   :  { %2775 = vmatprep.subr.bf16.mxu1 %v3211_v27 }
 0x1b8   :  { %2776 = vmatpush3.bf16.msra.mxu1 %v3212_v31 }
 0x1b9   :  { %2777 = vmatprep.subr.bf16.mxu1 %v3213_v32 }
 0x1bc   :  { %2778 = vmatpush3.bf16.msra.mxu1 %v3214_v33 }
 0x1bd   :  { %2779 = vmatprep.subr.bf16.mxu1 %v3215_v34 }
 0x1c0   :  { %2780 = vmatpush3.bf16.msra.mxu1 %v3216_v35 }
 0x1c1   :  { %2781 = vmatprep.subr.bf16.mxu1 %v3217_v22 }
 0x1c4   :  { %2782 = vmatpush3.bf16.msra.mxu1 %v3218_v36 }
 0x1c5   :  { %2783 = vmatprep.subr.bf16.mxu1 %v3219_v23 }
 0x1c8   :  { %2784 = vmatpush3.bf16.msra.mxu1 %v3220_v29 }
 0x1c9   :  { %2785 = vmatprep.subr.bf16.mxu1 %v3221_v38 }
 0x1cc   :  { %2786 = vmatpush3.bf16.msra.mxu1 %v3222_v39 }
 0x1cd   :  { %2787 = vmatprep.subr.bf16.mxu1 %v3223_v42 }
 0x1d0   :  { %2788 = vmatpush3.bf16.msra.mxu1 %v3224_v43 }
 0x1f3   :  { %v1937_v37 = vpop.f32.mrf.mxu0 }
 0x1f4   :  { %v1938_v48 = vadd.f32 %v1937_v37, %v1246_v47 }
 0x1f5   :  { %v1939_v40 = vpop.f32.mrf.mxu0 }
 0x1f6   :  { %v1940_v52 = vadd.f32 %v1939_v40, %v1250_v49 }
 0x1f7   :  { %v1941_v41 = vpop.f32.mrf.mxu0 }
 0x1f9   :  { %v1942_v44 = vpop.f32.mrf.mxu0 }
 0x233   :  { %v2019_v50 = vpop.f32.mrf.mxu0  ;;  %v1978_v51 = vpop.f32.mrf.mxu1 }
 0x234   :  { %v1979_v53 = vadd.f32 %v1978_v51, %v1938_v48  ;;  %v2020_v1 = vadd.f32 %v2019_v50, %v1254_v28 }
 0x235   :  { %v2021_v54 = vpop.f32.mrf.mxu0  ;;  %v1980_v55 = vpop.f32.mrf.mxu1 }
 0x236   :  { %v1981_v56 = vadd.f32 %v1980_v55, %v1940_v52  ;;  %v2067_v57 = vmax.f32 %v1979_v53, 0.0  ;;  %v2022_v3 = vadd.f32 %v2021_v54, %v1258_v30 }
 0x237   :  { %v2023_v58 = vpop.f32.mrf.mxu0  ;;  %v1982_v59 = vpop.f32.mrf.mxu1 }
 0x238   :  { %v2068_v60 = vmax.f32 %v1981_v56, 0.0  ;;  %v2071_v0 = vpack.c.bf16 %v2067_v57, %v2067_v57 }
 0x239   :  { %v2024_v61 = vpop.f32.mrf.mxu0  ;;  %v1983_v62 = vpop.f32.mrf.mxu1 }
 0x23a   :  { %v2072_v63 = vpack.c.bf16 %v2068_v60, %v2068_v60 }
 0x23c   :  { %2370 = vmatprep.mubr.bf16.mxu0 %v2072_v63 }
 0x23d   :  { %2371 = vmatmul.mubr.bf16.vlgmr.msra.gmra.mxu0 %v2071_v0 }
 0x273   :  { %v2060_v2 = vpop.f32.mrf.mxu1 }
 0x274   :  { %v2061_v4 = vadd.f32 %v2060_v2, %v2020_v1 }
 0x275   :  { %v2062_v5 = vpop.f32.mrf.mxu1 }
 0x276   :  { %v2063_v6 = vadd.f32 %v2062_v5, %v2022_v3  ;;  %v2069_v7 = vmax.f32 %v2061_v4, 0.0 }
 0x277   :  { %v2064_v8 = vpop.f32.mrf.mxu1 }
 0x278   :  { %v2070_v9 = vmax.f32 %v2063_v6, 0.0  ;;  %v2073_v14 = vpack.c.bf16 %v2069_v7, %v2069_v7 }
 0x279   :  { %v2065_v11 = vpop.f32.mrf.mxu1 }
 0x27a   :  { %v2074_v13 = vpack.c.bf16 %v2070_v9, %v2070_v9 }
 0x27c   :  { %2410 = vmatprep.mubr.bf16.mxu1 %v2074_v13 }
 0x27d   :  { %2411 = vmatmul.mubr.bf16.vlgmr.msra.gmra.mxu1 %v2073_v14 }
 0x2fd   :  { %v2767_v15 = vpop.f32.mrf.mxu0 }
 0x2ff   :  { %v2768_v16 = vpop.f32.mrf.mxu0 }
 0x300   :  { %v2769_v46 = vadd.f32 %v2768_v16, %v2767_v15 }
 0x301   :  { %v2770_v10 = vpop.f32.mrf.mxu0 }
 0x302   :  { %v2373_v20 = vadd.f32 %v2769_v46, %v2718_v12 }
 0x303   :  { %v2771_v17 = vpop.f32.mrf.mxu0 }
 0x33d   :  { %v2789_v18 = vpop.f32.mrf.mxu1 }
 0x33f   :  { %v2790_v19 = vpop.f32.mrf.mxu1 }
 0x340   :  { %v2791_v21 = vadd.f32 %v2790_v19, %v2789_v18 }
 0x341   :  { %v2792_v24 = vpop.f32.mrf.mxu1 }
 0x342   :  { %v2413_v25 = vadd.f32 %v2791_v21, %v2373_v20 }
 0x343   :  { %v2793_v26 = vpop.f32.mrf.mxu1 }
 0x344   :  { %2418 = vst [vmem:[#allocation8] sm:$0xff] %v2413_v25 }
 0x34b   :  { %v2437_v27 = vld [vmem:[#allocation8] sm:$0x3] }
 0x34c   :  { %2438 = vst [vmem:[%s3422_s7] sm:$0x3] %v2437_v27 }
 0x34d   :  { %2456 = vsyncpa [#allocation4], 1 }
 0x34e   :  { %2457 = vsyncpa [#allocation6], 1 }

</bundles_post_ra>
